<compile_context>
chip_gen: v5e
topology: v5e:2x2
jax: 0.10.0
libtpu: 0.0.40
codegen_flags: <defaults>
</compile_context>

<pallas_src>
import functools

import jax
import jax.numpy as jnp
from jax import lax
from jax.experimental import pallas as pl
from jax.experimental.pallas import tpu as pltpu


def detector_kernel(x_ref, w1t_ref, shift_ref, w2_ref, b2_ref, o_ref, xs_ref,
                    *, H, W, OFF):
    """One batch element per grid step.

    x_ref     : (1, Cin, H*W)   bf16  flattened NCHW input
    w1t_ref   : (9, Cmid, Cin)  bf16  3x3 weights, BN scale folded, tap-major
    shift_ref : (Cmid, 1)       f32   folded conv1 bias + BN shift
    w2_ref    : (Cmid, Cout)    f32   1x1 conv weights
    b2_ref    : (Cout, 1)       f32   1x1 conv bias
    o_ref     : (1, Cout, H*W)  f32   output (lane-dense along H*W)
    xs_ref    : (Cin, OFF+H*W+W+1) bf16 scratch: zero-padded flat image
    """
    HW = H * W
    cin = xs_ref.shape[0]
    cout = w2_ref.shape[1]
    halo = W + 1

    # Build the zero-padded, spatially-flattened image.  Only the two halo
    # slabs the shifted views read need zeroing; everything else in the read
    # window [OFF-halo, OFF+HW+halo) is overwritten by the image store below,
    # so the kernel has no dependence on prior scratch contents (safe under
    # megacore grid sharding) and skips a full-scratch memset.
    zeros_halo = jnp.zeros((cin, halo), xs_ref.dtype)
    xs_ref[:, pl.ds(OFF - halo, halo)] = zeros_halo
    xs_ref[:, pl.ds(OFF + HW, halo)] = zeros_halo
    xs_ref[:, pl.ds(OFF, HW)] = x_ref[0]

    # Taps shifted by kx = 0 / 2 wrap across image rows in the flat layout;
    # mask the first / last output column of the image for those tap groups.
    col_w = lax.broadcasted_iota(jnp.int32, (1, HW), 1) % W
    mask_l = col_w != 0            # kx == 0 taps must not write w == 0
    mask_r = col_w != (W - 1)      # kx == 2 taps must not write w == W-1

    # 3x3 conv as 9 (Cmid, Cin) @ (Cin, H*W) bf16 MXU matmuls, f32 accumulate.
    def tap(ky, kx):
        d = OFF + (ky - 1) * W + (kx - 1)          # static lane offset
        return jnp.dot(w1t_ref[ky * 3 + kx], xs_ref[:, pl.ds(d, HW)],
                       preferred_element_type=jnp.float32)

    acc_l = tap(0, 0) + tap(1, 0) + tap(2, 0)      # kx == 0 column
    acc_c = tap(0, 1) + tap(1, 1) + tap(2, 1)      # kx == 1 column
    acc_r = tap(0, 2) + tap(1, 2) + tap(2, 2)      # kx == 2 column
    acc = (acc_c
           + jnp.where(mask_l, acc_l, 0.0)
           + jnp.where(mask_r, acc_r, 0.0))

    # Folded conv1 bias + BatchNorm affine, then ReLU (f32, VPU).
    h_act = jnp.maximum(acc + shift_ref[...], 0.0)      # (Cmid, H*W)

    # 1x1 conv.  For Cout == 1 use a VPU multiply + sublane reduce (result is
    # already lane-dense along H*W); general Cout falls back to an MXU matmul
    # that also produces a lane-dense (Cout, H*W) slab.
    if cout == 1:
        out = jnp.sum(h_act * w2_ref[...], axis=0, keepdims=True) + b2_ref[...]
    else:
        out = lax.dot_general(w2_ref[...], h_act,
                              (((0,), (0,)), ((), ())),
                              preferred_element_type=jnp.float32) + b2_ref[...]
    o_ref[0] = out.astype(o_ref.dtype)


@jax.jit
def detector_forward(x_nchw, w1, b1, bn_gamma, bn_beta, bn_mean, bn_var, w2, b2,
                     eps=1e-5):
    """x_nchw: (N, Cin, H, W) float32.  Returns (N, Cout, H, W) float32."""
    N, Cin, H, W = x_nchw.shape
    Cmid = w1.shape[3]
    Cout = w2.shape[1]
    HW = H * W
    OFF = max(128, pl.cdiv(W + 1, 128) * 128)   # lane-aligned halo offset
    S = OFF + HW + W + 1                        # flat padded-image length

    # Fold eval-mode BatchNorm + conv1 bias into the conv1 weights / one shift:
    #   w1' = w1 * scale      shift' = b1*scale + (beta - mean*scale)
    scale = bn_gamma / jnp.sqrt(bn_var + eps)
    w1f = w1 * scale[None, None, None, :]
    # (3,3,Cin,Cmid) -> (9, Cmid, Cin), bf16 MXU operand.
    w1t = jnp.transpose(w1f, (0, 1, 3, 2)).reshape(9, Cmid, Cin).astype(jnp.bfloat16)
    shift = (b1 * scale + bn_beta - bn_mean * scale).reshape(Cmid, 1).astype(jnp.float32)
    x_flat = x_nchw.reshape(N, Cin, HW).astype(jnp.bfloat16)
    w2k = w2.astype(jnp.float32)
    b2k = b2.reshape(Cout, 1).astype(jnp.float32)

    kernel = functools.partial(detector_kernel, H=H, W=W, OFF=OFF)
    out = pl.pallas_call(
        kernel,
        out_shape=jax.ShapeDtypeStruct((N, Cout, HW), jnp.float32),
        grid_spec=pltpu.PrefetchScalarGridSpec(
            num_scalar_prefetch=0,
            grid=(N,),
            in_specs=[
                pl.BlockSpec((1, Cin, HW), lambda n: (n, 0, 0)),
                pl.BlockSpec((9, Cmid, Cin), lambda n: (0, 0, 0)),
                pl.BlockSpec((Cmid, 1), lambda n: (0, 0)),
                pl.BlockSpec((Cmid, Cout), lambda n: (0, 0)),
                pl.BlockSpec((Cout, 1), lambda n: (0, 0)),
            ],
            out_specs=pl.BlockSpec((1, Cout, HW), lambda n: (n, 0, 0)),
            scratch_shapes=[pltpu.VMEM((Cin, S), jnp.bfloat16)],
        ),
        compiler_params=pltpu.CompilerParams(
            dimension_semantics=("parallel",)),
    )(x_flat, w1t, shift, w2k, b2k)
    return out.reshape(N, Cout, H, W)


def reference_forward(x_nchw, w1, b1, bn_gamma, bn_beta, bn_mean, bn_var, w2, b2,
                      eps=1e-5):
    """Plain-JAX reference (eval-mode BN), NCHW, with the same bf16 operand
    quantization on the 3x3 conv as the kernel (math in f32)."""
    scale = bn_gamma / jnp.sqrt(bn_var + eps)
    w1f = (w1 * scale[None, None, None, :]).astype(jnp.bfloat16).astype(jnp.float32)
    xq = x_nchw.astype(jnp.bfloat16).astype(jnp.float32)
    shift = b1 * scale + bn_beta - bn_mean * scale
    y = lax.conv_general_dilated(
        xq, w1f, window_strides=(1, 1), padding=((1, 1), (1, 1)),
        dimension_numbers=("NCHW", "HWIO", "NCHW"),
        precision=lax.Precision.HIGHEST)
    y = jnp.maximum(y + shift[None, :, None, None], 0.0)
    out = jnp.einsum("nchw,co->nohw", y, w2,
                     precision=lax.Precision.HIGHEST) + b2[None, :, None, None]
    return out


if __name__ == "__main__":
    N, Cin, H, W = 2, 128, 16, 16   # module default in_channels=128
    Cmid, Cout = Cin // 2, 1

    key = jax.random.PRNGKey(0)
    k_x, k_w1, k_b1, k_w2, k_b2 = jax.random.split(key, 5)

    # Deterministic parameter init (fan-in scaled uniform, like PyTorch's default).
    x = jax.random.normal(k_x, (N, Cin, H, W), jnp.float32)          # NCHW
    bound1 = 1.0 / (Cin * 3 * 3) ** 0.5
    w1 = jax.random.uniform(k_w1, (3, 3, Cin, Cmid), jnp.float32, -bound1, bound1)
    b1 = jax.random.uniform(k_b1, (Cmid,), jnp.float32, -bound1, bound1)
    bound2 = 1.0 / Cmid ** 0.5
    w2 = jax.random.uniform(k_w2, (Cmid, Cout), jnp.float32, -bound2, bound2)
    b2 = jax.random.uniform(k_b2, (Cout,), jnp.float32, -bound2, bound2)

    # BatchNorm2d defaults: gamma=1, beta=0, running_mean=0, running_var=1.
    bn_gamma = jnp.ones((Cmid,), jnp.float32)
    bn_beta = jnp.zeros((Cmid,), jnp.float32)
    bn_mean = jnp.zeros((Cmid,), jnp.float32)
    bn_var = jnp.ones((Cmid,), jnp.float32)

    out = detector_forward(x, w1, b1, bn_gamma, bn_beta, bn_mean, bn_var, w2, b2)
    out = jax.block_until_ready(out)

    ref = reference_forward(x, w1, b1, bn_gamma, bn_beta, bn_mean, bn_var, w2, b2)
    assert out.shape == (N, Cout, H, W)
    assert jnp.allclose(out, ref, atol=1e-3, rtol=1e-3), "mismatch vs reference"

    print("KERNEL_OK")
</pallas_src>

<mosaic_0001>
module attributes {stable_mosaic.version = 11 : i64} {
  func.func @detector_kernel(%arg0: i32, %arg1: memref<1x128x256xbf16, #tpu.memory_space<vmem>>, %arg2: memref<9x64x128xbf16, #tpu.memory_space<vmem>>, %arg3: memref<64x1xf32, #tpu.memory_space<vmem>>, %arg4: memref<64x1xf32, #tpu.memory_space<vmem>>, %arg5: memref<1x1xf32, #tpu.memory_space<vmem>>, %arg6: memref<1x1x256xf32, #tpu.memory_space<vmem>>, %arg7: memref<128x401xbf16, #tpu.memory_space<vmem>>) attributes {dimension_semantics = [#tpu.dimension_semantics<parallel>], iteration_bounds = array<i64: 2>, scalar_prefetch = 0 : i64, scratch_operands = 1 : i64, tpu.core_type = #tpu.core_type<tc>, window_params = [{transform_indices = @transform_0, window_bounds = array<i64: 1, 128, 256>}, {pipeline_mode = #tpu.pipeline_mode<synchronous>, transform_indices = @transform_1, window_bounds = array<i64: 9, 64, 128>}, {pipeline_mode = #tpu.pipeline_mode<synchronous>, transform_indices = @transform_2, window_bounds = array<i64: 64, 1>}, {pipeline_mode = #tpu.pipeline_mode<synchronous>, transform_indices = @transform_3, window_bounds = array<i64: 64, 1>}, {pipeline_mode = #tpu.pipeline_mode<synchronous>, transform_indices = @transform_4, window_bounds = array<i64: 1, 1>}, {transform_indices = @transform_5, window_bounds = array<i64: 1, 1, 256>}]} {
    %cst = arith.constant 0.000000e+00 : bf16
    %0 = vector.broadcast %cst : bf16 to vector<128x17xbf16>
    %c0 = arith.constant 0 : index
    %c111 = arith.constant 111 : index
    %1 = vector.load %arg7[%c0, %c111] : memref<128x401xbf16, #tpu.memory_space<vmem>>, vector<128x17xbf16>
    tpu.vector_store %arg7[%c0, %c111], %0 {strides = array<i32>} : memref<128x401xbf16, #tpu.memory_space<vmem>>, vector<128x17xbf16>,
    %c0_0 = arith.constant 0 : index
    %c384 = arith.constant 384 : index
    %2 = vector.load %arg7[%c0_0, %c384] : memref<128x401xbf16, #tpu.memory_space<vmem>>, vector<128x17xbf16>
    tpu.vector_store %arg7[%c0_0, %c384], %0 {strides = array<i32>} : memref<128x401xbf16, #tpu.memory_space<vmem>>, vector<128x17xbf16>,
    %c0_1 = arith.constant 0 : index
    %c0_2 = arith.constant 0 : index
    %c0_3 = arith.constant 0 : index
    %3 = vector.load %arg1[%c0_1, %c0_2, %c0_3] : memref<1x128x256xbf16, #tpu.memory_space<vmem>>, vector<1x128x256xbf16>
    %4 = vector.shape_cast %3 : vector<1x128x256xbf16> to vector<128x256xbf16>
    %c0_4 = arith.constant 0 : index
    %c128 = arith.constant 128 : index
    %5 = vector.load %arg7[%c0_4, %c128] : memref<128x401xbf16, #tpu.memory_space<vmem>>, vector<128x256xbf16>
    tpu.vector_store %arg7[%c0_4, %c128], %4 {strides = array<i32>} : memref<128x401xbf16, #tpu.memory_space<vmem>>, vector<128x256xbf16>,
    %6 = tpu.iota {dimensions = array<i32: 1>} : vector<1x256xi32>
    %c16_i32 = arith.constant 16 : i32
    %c0_i32 = arith.constant 0 : i32
    %7 = arith.cmpi eq, %c16_i32, %c0_i32 : i32
    %c1_i32 = arith.constant 1 : i32
    %8 = arith.select %7, %c1_i32, %c16_i32 : i32
    %9 = vector.broadcast %8 : i32 to vector<1x256xi32>
    %10 = arith.remsi %6, %9 : vector<1x256xi32>
    %c0_i32_5 = arith.constant 0 : i32
    %11 = vector.broadcast %c0_i32_5 : i32 to vector<1x256xi32>
    %12 = arith.cmpi ne, %10, %11 : vector<1x256xi32>
    %c0_i32_6 = arith.constant 0 : i32
    %13 = vector.broadcast %c0_i32_6 : i32 to vector<1x256xi32>
    %14 = arith.cmpi slt, %10, %13 : vector<1x256xi32>
    %c0_i32_7 = arith.constant 0 : i32
    %15 = arith.cmpi slt, %8, %c0_i32_7 : i32
    %16 = vector.broadcast %15 : i1 to vector<1x256xi1>
    %17 = vector.broadcast %16 : vector<1x256xi1> to vector<1x256xi1>
    %18 = arith.xori %14, %17 : vector<1x256xi1>
    %19 = arith.andi %18, %12 : vector<1x256xi1>
    %20 = vector.broadcast %8 : i32 to vector<1x256xi32>
    %21 = arith.addi %10, %20 : vector<1x256xi32>
    %22 = arith.select %19, %21, %10 : vector<1x256xi1>, vector<1x256xi32>
    %c0_i32_8 = arith.constant 0 : i32
    %23 = vector.broadcast %c0_i32_8 : i32 to vector<1x256xi32>
    %24 = arith.cmpi ne, %22, %23 : vector<1x256xi32>
    %c15_i32 = arith.constant 15 : i32
    %25 = vector.broadcast %c15_i32 : i32 to vector<1x256xi32>
    %26 = arith.cmpi ne, %22, %25 : vector<1x256xi32>
    %c0_9 = arith.constant 0 : index
    %c0_10 = arith.constant 0 : index
    %c0_11 = arith.constant 0 : index
    %27 = vector.load %arg2[%c0_9, %c0_10, %c0_11] : memref<9x64x128xbf16, #tpu.memory_space<vmem>>, vector<1x64x128xbf16>
    %28 = vector.shape_cast %27 : vector<1x64x128xbf16> to vector<64x128xbf16>
    %c0_12 = arith.constant 0 : index
    %c111_13 = arith.constant 111 : index
    %29 = vector.load %arg7[%c0_12, %c111_13] : memref<128x401xbf16, #tpu.memory_space<vmem>>, vector<128x256xbf16>
    %cst_14 = arith.constant dense<0.000000e+00> : vector<64x256xf32>
    %30 = tpu.matmul %28, %29, %cst_14 {dimension_numbers = #tpu.dot_dimension_numbers<[1], [0], [0], [1], [0, 0, 1, 1], [], []>} : vector<64x128xbf16>, vector<128x256xbf16>, vector<64x256xf32> -> vector<64x256xf32>
    %c3 = arith.constant 3 : index
    %c0_15 = arith.constant 0 : index
    %c0_16 = arith.constant 0 : index
    %31 = vector.load %arg2[%c3, %c0_15, %c0_16] : memref<9x64x128xbf16, #tpu.memory_space<vmem>>, vector<1x64x128xbf16>
    %32 = vector.shape_cast %31 : vector<1x64x128xbf16> to vector<64x128xbf16>
    %c0_17 = arith.constant 0 : index
    %c127 = arith.constant 127 : index
    %33 = vector.load %arg7[%c0_17, %c127] : memref<128x401xbf16, #tpu.memory_space<vmem>>, vector<128x256xbf16>
    %cst_18 = arith.constant dense<0.000000e+00> : vector<64x256xf32>
    %34 = tpu.matmul %32, %33, %cst_18 {dimension_numbers = #tpu.dot_dimension_numbers<[1], [0], [0], [1], [0, 0, 1, 1], [], []>} : vector<64x128xbf16>, vector<128x256xbf16>, vector<64x256xf32> -> vector<64x256xf32>
    %35 = arith.addf %30, %34 : vector<64x256xf32>
    %c6 = arith.constant 6 : index
    %c0_19 = arith.constant 0 : index
    %c0_20 = arith.constant 0 : index
    %36 = vector.load %arg2[%c6, %c0_19, %c0_20] : memref<9x64x128xbf16, #tpu.memory_space<vmem>>, vector<1x64x128xbf16>
    %37 = vector.shape_cast %36 : vector<1x64x128xbf16> to vector<64x128xbf16>
    %c0_21 = arith.constant 0 : index
    %c143 = arith.constant 143 : index
    %38 = vector.load %arg7[%c0_21, %c143] : memref<128x401xbf16, #tpu.memory_space<vmem>>, vector<128x256xbf16>
    %cst_22 = arith.constant dense<0.000000e+00> : vector<64x256xf32>
    %39 = tpu.matmul %37, %38, %cst_22 {dimension_numbers = #tpu.dot_dimension_numbers<[1], [0], [0], [1], [0, 0, 1, 1], [], []>} : vector<64x128xbf16>, vector<128x256xbf16>, vector<64x256xf32> -> vector<64x256xf32>
    %40 = arith.addf %35, %39 : vector<64x256xf32>
    %c1 = arith.constant 1 : index
    %c0_23 = arith.constant 0 : index
    %c0_24 = arith.constant 0 : index
    %41 = vector.load %arg2[%c1, %c0_23, %c0_24] : memref<9x64x128xbf16, #tpu.memory_space<vmem>>, vector<1x64x128xbf16>
    %42 = vector.shape_cast %41 : vector<1x64x128xbf16> to vector<64x128xbf16>
    %c0_25 = arith.constant 0 : index
    %c112 = arith.constant 112 : index
    %43 = vector.load %arg7[%c0_25, %c112] : memref<128x401xbf16, #tpu.memory_space<vmem>>, vector<128x256xbf16>
    %cst_26 = arith.constant dense<0.000000e+00> : vector<64x256xf32>
    %44 = tpu.matmul %42, %43, %cst_26 {dimension_numbers = #tpu.dot_dimension_numbers<[1], [0], [0], [1], [0, 0, 1, 1], [], []>} : vector<64x128xbf16>, vector<128x256xbf16>, vector<64x256xf32> -> vector<64x256xf32>
    %c4 = arith.constant 4 : index
    %c0_27 = arith.constant 0 : index
    %c0_28 = arith.constant 0 : index
    %45 = vector.load %arg2[%c4, %c0_27, %c0_28] : memref<9x64x128xbf16, #tpu.memory_space<vmem>>, vector<1x64x128xbf16>
    %46 = vector.shape_cast %45 : vector<1x64x128xbf16> to vector<64x128xbf16>
    %c0_29 = arith.constant 0 : index
    %c128_30 = arith.constant 128 : index
    %47 = vector.load %arg7[%c0_29, %c128_30] : memref<128x401xbf16, #tpu.memory_space<vmem>>, vector<128x256xbf16>
    %cst_31 = arith.constant dense<0.000000e+00> : vector<64x256xf32>
    %48 = tpu.matmul %46, %47, %cst_31 {dimension_numbers = #tpu.dot_dimension_numbers<[1], [0], [0], [1], [0, 0, 1, 1], [], []>} : vector<64x128xbf16>, vector<128x256xbf16>, vector<64x256xf32> -> vector<64x256xf32>
    %49 = arith.addf %44, %48 : vector<64x256xf32>
    %c7 = arith.constant 7 : index
    %c0_32 = arith.constant 0 : index
    %c0_33 = arith.constant 0 : index
    %50 = vector.load %arg2[%c7, %c0_32, %c0_33] : memref<9x64x128xbf16, #tpu.memory_space<vmem>>, vector<1x64x128xbf16>
    %51 = vector.shape_cast %50 : vector<1x64x128xbf16> to vector<64x128xbf16>
    %c0_34 = arith.constant 0 : index
    %c144 = arith.constant 144 : index
    %52 = vector.load %arg7[%c0_34, %c144] : memref<128x401xbf16, #tpu.memory_space<vmem>>, vector<128x256xbf16>
    %cst_35 = arith.constant dense<0.000000e+00> : vector<64x256xf32>
    %53 = tpu.matmul %51, %52, %cst_35 {dimension_numbers = #tpu.dot_dimension_numbers<[1], [0], [0], [1], [0, 0, 1, 1], [], []>} : vector<64x128xbf16>, vector<128x256xbf16>, vector<64x256xf32> -> vector<64x256xf32>
    %54 = arith.addf %49, %53 : vector<64x256xf32>
    %c2 = arith.constant 2 : index
    %c0_36 = arith.constant 0 : index
    %c0_37 = arith.constant 0 : index
    %55 = vector.load %arg2[%c2, %c0_36, %c0_37] : memref<9x64x128xbf16, #tpu.memory_space<vmem>>, vector<1x64x128xbf16>
    %56 = vector.shape_cast %55 : vector<1x64x128xbf16> to vector<64x128xbf16>
    %c0_38 = arith.constant 0 : index
    %c113 = arith.constant 113 : index
    %57 = vector.load %arg7[%c0_38, %c113] : memref<128x401xbf16, #tpu.memory_space<vmem>>, vector<128x256xbf16>
    %cst_39 = arith.constant dense<0.000000e+00> : vector<64x256xf32>
    %58 = tpu.matmul %56, %57, %cst_39 {dimension_numbers = #tpu.dot_dimension_numbers<[1], [0], [0], [1], [0, 0, 1, 1], [], []>} : vector<64x128xbf16>, vector<128x256xbf16>, vector<64x256xf32> -> vector<64x256xf32>
    %c5 = arith.constant 5 : index
    %c0_40 = arith.constant 0 : index
    %c0_41 = arith.constant 0 : index
    %59 = vector.load %arg2[%c5, %c0_40, %c0_41] : memref<9x64x128xbf16, #tpu.memory_space<vmem>>, vector<1x64x128xbf16>
    %60 = vector.shape_cast %59 : vector<1x64x128xbf16> to vector<64x128xbf16>
    %c0_42 = arith.constant 0 : index
    %c129 = arith.constant 129 : index
    %61 = vector.load %arg7[%c0_42, %c129] : memref<128x401xbf16, #tpu.memory_space<vmem>>, vector<128x256xbf16>
    %cst_43 = arith.constant dense<0.000000e+00> : vector<64x256xf32>
    %62 = tpu.matmul %60, %61, %cst_43 {dimension_numbers = #tpu.dot_dimension_numbers<[1], [0], [0], [1], [0, 0, 1, 1], [], []>} : vector<64x128xbf16>, vector<128x256xbf16>, vector<64x256xf32> -> vector<64x256xf32>
    %63 = arith.addf %58, %62 : vector<64x256xf32>
    %c8 = arith.constant 8 : index
    %c0_44 = arith.constant 0 : index
    %c0_45 = arith.constant 0 : index
    %64 = vector.load %arg2[%c8, %c0_44, %c0_45] : memref<9x64x128xbf16, #tpu.memory_space<vmem>>, vector<1x64x128xbf16>
    %65 = vector.shape_cast %64 : vector<1x64x128xbf16> to vector<64x128xbf16>
    %c0_46 = arith.constant 0 : index
    %c145 = arith.constant 145 : index
    %66 = vector.load %arg7[%c0_46, %c145] : memref<128x401xbf16, #tpu.memory_space<vmem>>, vector<128x256xbf16>
    %cst_47 = arith.constant dense<0.000000e+00> : vector<64x256xf32>
    %67 = tpu.matmul %65, %66, %cst_47 {dimension_numbers = #tpu.dot_dimension_numbers<[1], [0], [0], [1], [0, 0, 1, 1], [], []>} : vector<64x128xbf16>, vector<128x256xbf16>, vector<64x256xf32> -> vector<64x256xf32>
    %68 = arith.addf %63, %67 : vector<64x256xf32>
    %cst_48 = arith.constant 0.000000e+00 : f32
    %69 = vector.shape_cast %24 : vector<1x256xi1> to vector<1x256xi1>
    %70 = vector.broadcast %69 : vector<1x256xi1> to vector<64x256xi1>
    %71 = vector.broadcast %cst_48 : f32 to vector<64x256xf32>
    %72 = arith.select %70, %40, %71 : vector<64x256xi1>, vector<64x256xf32>
    %73 = arith.addf %54, %72 : vector<64x256xf32>
    %cst_49 = arith.constant 0.000000e+00 : f32
    %74 = vector.shape_cast %26 : vector<1x256xi1> to vector<1x256xi1>
    %75 = vector.broadcast %74 : vector<1x256xi1> to vector<64x256xi1>
    %76 = vector.broadcast %cst_49 : f32 to vector<64x256xf32>
    %77 = arith.select %75, %68, %76 : vector<64x256xi1>, vector<64x256xf32>
    %78 = arith.addf %73, %77 : vector<64x256xf32>
    %c0_50 = arith.constant 0 : index
    %c0_51 = arith.constant 0 : index
    %79 = vector.load %arg3[%c0_50, %c0_51] : memref<64x1xf32, #tpu.memory_space<vmem>>, vector<64x1xf32>
    %80 = vector.broadcast %79 : vector<64x1xf32> to vector<64x256xf32>
    %81 = arith.addf %78, %80 : vector<64x256xf32>
    %cst_52 = arith.constant 0.000000e+00 : f32
    %82 = vector.broadcast %cst_52 : f32 to vector<64x256xf32>
    %83 = arith.maximumf %81, %82 : vector<64x256xf32>
    %c0_53 = arith.constant 0 : index
    %c0_54 = arith.constant 0 : index
    %84 = vector.load %arg4[%c0_53, %c0_54] : memref<64x1xf32, #tpu.memory_space<vmem>>, vector<64x1xf32>
    %85 = vector.broadcast %84 : vector<64x1xf32> to vector<64x256xf32>
    %86 = arith.mulf %83, %85 : vector<64x256xf32>
    %cst_55 = arith.constant dense<0.000000e+00> : vector<256xf32>
    %87 = vector.multi_reduction <add>, %86, %cst_55 [0] : vector<64x256xf32> to vector<256xf32>
    %88 = vector.shape_cast %87 : vector<256xf32> to vector<1x256xf32>
    %c0_56 = arith.constant 0 : index
    %c0_57 = arith.constant 0 : index
    %89 = vector.load %arg5[%c0_56, %c0_57] : memref<1x1xf32, #tpu.memory_space<vmem>>, vector<1x1xf32>
    %90 = vector.broadcast %89 : vector<1x1xf32> to vector<1x256xf32>
    %91 = arith.addf %88, %90 : vector<1x256xf32>
    %c0_58 = arith.constant 0 : index
    %c0_59 = arith.constant 0 : index
    %c0_60 = arith.constant 0 : index
    %92 = vector.load %arg6[%c0_58, %c0_59, %c0_60] : memref<1x1x256xf32, #tpu.memory_space<vmem>>, vector<1x1x256xf32>
    %93 = vector.shape_cast %92 : vector<1x1x256xf32> to vector<1x256xf32>
    %94 = vector.shape_cast %91 : vector<1x256xf32> to vector<1x1x256xf32>
    tpu.vector_store %arg6[%c0_58, %c0_59, %c0_60], %94 {strides = array<i32>} : memref<1x1x256xf32, #tpu.memory_space<vmem>>, vector<1x1x256xf32>,
    return
  }
  func.func @transform_0(%arg0: i32) -> (i32, i32, i32) {
    %c0_i32 = arith.constant 0 : i32
    %c0_i32_0 = arith.constant 0 : i32
    %c0_i32_1 = arith.constant 0 : i32
    return %arg0, %c0_i32, %c0_i32_0 : i32, i32, i32
  }
  func.func @transform_1(%arg0: i32) -> (i32, i32, i32) {
    %c0_i32 = arith.constant 0 : i32
    %c0_i32_0 = arith.constant 0 : i32
    %c0_i32_1 = arith.constant 0 : i32
    %c0_i32_2 = arith.constant 0 : i32
    return %c0_i32, %c0_i32_0, %c0_i32_1 : i32, i32, i32
  }
  func.func @transform_2(%arg0: i32) -> (i32, i32) {
    %c0_i32 = arith.constant 0 : i32
    %c0_i32_0 = arith.constant 0 : i32
    %c0_i32_1 = arith.constant 0 : i32
    return %c0_i32, %c0_i32_0 : i32, i32
  }
  func.func @transform_3(%arg0: i32) -> (i32, i32) {
    %c0_i32 = arith.constant 0 : i32
    %c0_i32_0 = arith.constant 0 : i32
    %c0_i32_1 = arith.constant 0 : i32
    return %c0_i32, %c0_i32_0 : i32, i32
  }
  func.func @transform_4(%arg0: i32) -> (i32, i32) {
    %c0_i32 = arith.constant 0 : i32
    %c0_i32_0 = arith.constant 0 : i32
    %c0_i32_1 = arith.constant 0 : i32
    return %c0_i32, %c0_i32_0 : i32, i32
  }
  func.func @transform_5(%arg0: i32) -> (i32, i32, i32) {
    %c0_i32 = arith.constant 0 : i32
    %c0_i32_0 = arith.constant 0 : i32
    %c0_i32_1 = arith.constant 0 : i32
    return %arg0, %c0_i32, %c0_i32_0 : i32, i32, i32
  }
}

</mosaic_0001>

<bundles_post_ra>
// kernel: detector_forward.1
= control target key start
LH: loop header
LB: loop body
LE: loop exit
PB: predicated region body
PF: predicated region fallthrough
CT: control target
= control target key end

     0   :  { %s3181_s20 = smov 0   ;;  %s4690_s0 = inlined_call_operand.vmem [shape: bf16[2,128,256], index: 0, kind: input, shape index: {}]   ;;  %s4691_s1 = inlined_call_operand.vmem [shape: bf16[9,64,128], index: 1, kind: input, shape index: {}]   ;;  %s4692_s2 = inlined_call_operand.vmem [shape: f32[64,1], index: 2, kind: input, shape index: {}]   ;;  %s4693_s3 = inlined_call_operand.vmem [shape: f32[64,1], index: 3, kind: input, shape index: {}]   ;;  %s4694_s4 = inlined_call_operand.<no memory space> [shape: f32[1,1], index: 4, kind: input, shape index: {}]   ;;  %s4695_s5 = inlined_call_operand.vmem [shape: f32[2,1,256], index: 5, kind: output, shape index: {}]  }
   0x1   :  { %v10_v0 = vstv %s4694_s4 }
   0x2   :  { %11 = vst [vmem:[#allocation3] sm:$0x1] %v10_v0 }
   0x3 LB: > { %s2520_s21 = sadd.s32 4294967295, %s3137_s20   ;;  %p2524_p0 = scmp.ge.s32.totalorder %s3137_s20, 1  ;;  %s3137_s20 = sphi %s3181_s20, %s17_s20  }
   0x4   : > { %p189_p1 = scmp.lt.s32.totalorder %s3137_s20, 3 }
   0x6   : > { %p190_p2 = pnand %p2524_p0, %p189_p1 }
   0x8   : > { %193 = sbr.rel (%p190_p2) target bundleno = 874 (0x36a), region = 40 }
   0xd   : > { %vm226_vm0 = vcmask 1044344   ;;  %p216_p3 = scmp.lt.s32.totalorder %s2520_s21, 1  ;;  %v3139_v1 = vmov 0   ;;  %s3140_s25 = smov 1   ;;  %vm243_vm1 = vcmask 134144   ;;  %vm548_vm2 = vcmask 7168  }
   0xe   : > { %229 = vst.msk [vmem:[#allocation2 + $0x20] sm:$0xf] %vm226_vm0, %v3139_v1  ;;  %3129 = vset.pattern.permute.xlu1 %v3139_v1  ;;  %3128 = vset.pattern.permute.xlu0 %v3139_v1  ;;  %s3141_s26 = smov 17   ;;  %s3142_s27 = smov 113   ;;  %vm711_vm3 = vcmask 138240   ;;  %vm1019_vm4 = vcmask 924672  }
   0xf   : > { %230 = vst.msk [vmem:[#allocation2 + $0x30] sm:$0xf] %vm226_vm0, %v3139_v1  ;;  %3130 = vset.pattern.permute.xlu2 %v3139_v1  ;;  %s4849_s21 = smov (!%p216_p3, %s2520_s21), 1  ;;  %s3143_s28 = smov 16   ;;  %vm1394_vm5 = vcmask 130048   ;;  %vm1566_vm6 = vcmask 916480  }
  0x10   : > { %227 = vst.msk [vmem:[#allocation2] sm:$0xf] %vm226_vm0, %v3139_v1  ;;  %s2994_s4 = sshll.u32 %s4849_s21, 7  ;;  %s3144_s29 = smov 112   ;;  %vm1763_vm7 = vcmask 1039360   ;;  %vm1926_vm8 = vcmask 121856  }
  0x11   : > { %228 = vst.msk [vmem:[#allocation2 + $0x10] sm:$0xf] %vm226_vm0, %v3139_v1  ;;  %s3222_s24 = scalar_lea.vmem %s4690_s0, %s2994_s4  ;;  %s3145_s13 = smov 127   ;;  %vm2098_vm9 = vcmask 908288   ;;  %vm2459_vm14 = vcmask 1040384  }
  0x12   : > { %231 = vst.msk [vmem:[#allocation2 + $0x40] sm:$0xf] %vm226_vm0, %v3139_v1  ;;  %v262_v8 = vld [vmem:[%s3222_s24 + $0x10] sm:$0xff]  ;;  %v263_v9 = vld [vmem:[%s3222_s24 + $0x18] sm:$0xff]  ;;  %v260_v12 = vld [vmem:[%s3222_s24] sm:$0xff]  ;;  %s3146_s10 = smov 15  }
  0x13   : > { %232 = vst.msk [vmem:[#allocation2 + $0x50] sm:$0xf] %vm226_vm0, %v3139_v1  ;;  %v261_v13 = vld [vmem:[%s3222_s24 + $0x8] sm:$0xff]  ;;  %v264_v15 = vld [vmem:[%s3222_s24 + $0x20] sm:$0xff]  ;;  %v266_v17 = vld [vmem:[%s3222_s24 + $0x30] sm:$0xff]  ;;  %s2527_s16 = sshll.u32 %s4849_s21, 1 }
  0x14   : > { %233 = vst.msk [vmem:[#allocation2 + $0x60] sm:$0xf] %vm226_vm0, %v3139_v1  ;;  %v265_v16 = vld [vmem:[%s3222_s24 + $0x28] sm:$0xff]  ;;  %v267_v18 = vld [vmem:[%s3222_s24 + $0x38] sm:$0xff]  ;;  %v268_v19 = vld [vmem:[%s3222_s24 + $0x40] sm:$0xff]  ;;  %s224_s19 = scalar_lea.vmem %s4695_s5, %s2527_s16 }
  0x15   : > { %v2566_v2 = vld [vmem:[#allocation2 + $0x20] sm:$0xf]  ;;  %234 = vst.msk [vmem:[#allocation2 + $0x70] sm:$0xf] %vm226_vm0, %v3139_v1  ;;  %v269_v20 = vld [vmem:[%s3222_s24 + $0x48] sm:$0xff]  ;;  %v270_v22 = vld [vmem:[%s3222_s24 + $0x50] sm:$0xff] }
  0x16   : > { %v3003_v3 = vld [vmem:[#allocation2 + $0x2c] sm:$0xf0]  ;;  %235 = vst.msk [vmem:[#allocation2 + $0x80] sm:$0xf] %vm226_vm0, %v3139_v1  ;;  %v271_v24 = vld [vmem:[%s3222_s24 + $0x58] sm:$0xff]  ;;  %v272_v32 = vld [vmem:[%s3222_s24 + $0x60] sm:$0xff] }
  0x17   : > { %v3213_v4 = vor.u32 %v3003_v3, %v2566_v2  ;;  %236 = vst.msk [vmem:[#allocation2 + $0x90] sm:$0xf] %vm226_vm0, %v3139_v1  ;;  %v2554_v5 = vld [vmem:[#allocation2] sm:$0xf]  ;;  %v273_v35 = vld [vmem:[%s3222_s24 + $0x68] sm:$0xff]  ;;  %v274_v43 = vld [vmem:[%s3222_s24 + $0x70] sm:$0xff] }
  0x18   : > { %237 = vst.msk [vmem:[#allocation2 + $0xa0] sm:$0xf] %vm226_vm0, %v3139_v1  ;;  %v3000_v6 = vld [vmem:[#allocation2 + $0xc] sm:$0xf0]  ;;  %v275_v44 = vld [vmem:[%s3222_s24 + $0x78] sm:$0xff] }
  0x19   : > { %4748 = vst [vmem:[#allocation4_spill] sm:$0xff] %v3213_v4  ;;  %506 = vrot.lane.b32.xlu1 %v3213_v4, %s3140_s25  ;;  %v3228_v7 = vor.u32 %v3000_v6, %v2554_v5  ;;  %v2578_v10 = vld [vmem:[#allocation2 + $0x40] sm:$0xf] }
  0x1a   : > { %238 = vst.msk [vmem:[#allocation2 + $0xb0] sm:$0xf] %vm226_vm0, %v3139_v1  ;;  %v3006_v11 = vld [vmem:[#allocation2 + $0x4c] sm:$0xf0] }
  0x1b   : > { %4749 = vst [vmem:[#allocation5_spill] sm:$0xff] %v3228_v7  ;;  %500 = vrot.lane.b32.xlu0 %v3228_v7, %s3140_s25  ;;  %v3244_v14 = vor.u32 %v3006_v11, %v2578_v10  ;;  %v2590_v36 = vld [vmem:[#allocation2 + $0x60] sm:$0xf] }
  0x1c   : > { %239 = vst.msk [vmem:[#allocation2 + $0xc0] sm:$0xf] %vm226_vm0, %v3139_v1  ;;  %v3009_v37 = vld [vmem:[#allocation2 + $0x6c] sm:$0xf0] }
  0x1d   : > { %240 = vst.msk [vmem:[#allocation2 + $0xd0] sm:$0xf] %vm226_vm0, %v3139_v1  ;;  %v3274_v42 = vor.u32 %v3009_v37, %v2590_v36  ;;  %v2602_v47 = vld [vmem:[#allocation2 + $0x80] sm:$0xf] }
  0x1e   : > { %241 = vst.msk [vmem:[#allocation2 + $0xe0] sm:$0xf] %vm226_vm0, %v3139_v1  ;;  %v3012_v50 = vld [vmem:[#allocation2 + $0x8c] sm:$0xf0] }
  0x1f   : > { %242 = vst.msk [vmem:[#allocation2 + $0xf0] sm:$0xf] %vm226_vm0, %v3139_v1  ;;  %v3288_v53 = vor.u32 %v3012_v50, %v2602_v47  ;;  %v2614_v56 = vld [vmem:[#allocation2 + $0xa0] sm:$0xf] }
  0x20   : > { %278 = vst [vmem:[#allocation2 + $0x24] sm:$0xff] %v262_v8 }
  0x21   : > { %4750 = vst [vmem:[#allocation6_spill] sm:$0xff] %v3244_v14  ;;  %v3015_v59 = vld [vmem:[#allocation2 + $0xac] sm:$0xf0] }
  0x22   : > { %279 = vst [vmem:[#allocation2 + $0x34] sm:$0xff] %v263_v9  ;;  %v3300_v62 = vor.u32 %v3015_v59, %v2614_v56 }
  0x23   : > { %276 = vst [vmem:[#allocation2 + $0x4] sm:$0xff] %v260_v12  ;;  %512 = vrot.lane.b32.xlu0 %v3244_v14, %s3140_s25  ;;  %v2626_v5 = vld [vmem:[#allocation2 + $0xc0] sm:$0xf] }
  0x24   : > { %277 = vst [vmem:[#allocation2 + $0x14] sm:$0xff] %v261_v13  ;;  %v3018_v6 = vld [vmem:[#allocation2 + $0xcc] sm:$0xf0] }
  0x25   : > { %280 = vst [vmem:[#allocation2 + $0x44] sm:$0xff] %v264_v15  ;;  %v3312_v10 = vor.u32 %v3018_v6, %v2626_v5 }
  0x26   : > { %281 = vst [vmem:[#allocation2 + $0x54] sm:$0xff] %v265_v16  ;;  %v2638_v16 = vld [vmem:[#allocation2 + $0xe0] sm:$0xf] }
  0x27   : > { %282 = vst [vmem:[#allocation2 + $0x64] sm:$0xff] %v266_v17  ;;  %v3002_v21 = vld [vmem:[#allocation2 + $0x24] sm:$0xf]  ;;  %v2574_v33 = vld [vmem:[#allocation2 + $0x28] sm:$0xf] }
  0x28   : > { %283 = vst [vmem:[#allocation2 + $0x74] sm:$0xff] %v267_v18  ;;  %v3021_v17 = vld [vmem:[#allocation2 + $0xec] sm:$0xf0]  ;;  %v2702_v47 = vld [vmem:[#allocation2 + $0x24] sm:$0xf] }
  0x29   : > { %v2568_v23 = vld [vmem:[#allocation2 + $0x30] sm:$0xf0]  ;;  %284 = vst [vmem:[#allocation2 + $0x84] sm:$0xff] %v268_v19  ;;  %v3004_v34 = vld [vmem:[#allocation2 + $0x34] sm:$0xf0] }
  0x2a   : > { %v3256_v25 = vor.u32 %v3002_v21, %v2568_v23  ;;  %v2562_v26 = vld [vmem:[#allocation2 + $0x8] sm:$0xf]  ;;  %v2999_v27 = vld [vmem:[#allocation2 + $0x4] sm:$0xf]  ;;  %285 = vst [vmem:[#allocation2 + $0x94] sm:$0xff] %v269_v20  ;;  %v3270_v40 = vor.u32 %v3004_v34, %v2574_v33  ;;  %v3324_v20 = vor.u32 %v3021_v17, %v2638_v16 }
  0x2b   : > { %v3001_v28 = vld [vmem:[#allocation2 + $0x14] sm:$0xf0]  ;;  %v2556_v29 = vld [vmem:[#allocation2 + $0x10] sm:$0xf0]  ;;  %286 = vst [vmem:[#allocation2 + $0xa4] sm:$0xff] %v270_v22 }
  0x2c   : > { %4751 = vst [vmem:[#allocation7_spill] sm:$0xff] %v3256_v25  ;;  %508 = vrot.lane.b32.xlu2 %v3256_v25, %s3140_s25  ;;  %v3260_v30 = vor.u32 %v3001_v28, %v2562_v26  ;;  %v3262_v31 = vor.u32 %v2999_v27, %v2556_v29  ;;  %v3005_v38 = vld [vmem:[#allocation2 + $0x44] sm:$0xf]  ;;  %v2586_v45 = vld [vmem:[#allocation2 + $0x48] sm:$0xf] }
  0x2d   : > { %287 = vst [vmem:[#allocation2 + $0xb4] sm:$0xff] %v271_v24  ;;  %v2580_v39 = vld [vmem:[#allocation2 + $0x50] sm:$0xf0]  ;;  %v3007_v46 = vld [vmem:[#allocation2 + $0x54] sm:$0xf0] }
  0x2e   : > { %4752 = vst [vmem:[#allocation8_spill] sm:$0xff] %v3260_v30  ;;  %504 = vrot.lane.b32.xlu1 %v3260_v30, %s3140_s25  ;;  %502 = vrot.lane.b32.xlu0 %v3262_v31, %s3140_s25  ;;  %v3272_v41 = vor.u32 %v3005_v38, %v2580_v39  ;;  %v3008_v48 = vld [vmem:[#allocation2 + $0x64] sm:$0xf]  ;;  %v3284_v51 = vor.u32 %v3007_v46, %v2586_v45  ;;  %v2598_v54 = vld [vmem:[#allocation2 + $0x68] sm:$0xf] }
  0x2f   : > { %4753 = vst [vmem:[#allocation9_spill] sm:$0xff] %v3262_v31  ;;  %v2592_v49 = vld [vmem:[#allocation2 + $0x70] sm:$0xf0]  ;;  %v3010_v55 = vld [vmem:[#allocation2 + $0x74] sm:$0xf0] }
  0x30   : > { %288 = vst [vmem:[#allocation2 + $0xc4] sm:$0xff] %v272_v32  ;;  %v3286_v52 = vor.u32 %v3008_v48, %v2592_v49  ;;  %v3011_v57 = vld [vmem:[#allocation2 + $0x84] sm:$0xf]  ;;  %v3296_v60 = vor.u32 %v3010_v55, %v2598_v54  ;;  %v2610_v63 = vld [vmem:[#allocation2 + $0x88] sm:$0xf] }
  0x31   : > { %4754 = vst [vmem:[#allocation10_spill] sm:$0xff] %v3270_v40  ;;  %v2604_v58 = vld [vmem:[#allocation2 + $0x90] sm:$0xf0]  ;;  %v3013_v0 = vld [vmem:[#allocation2 + $0x94] sm:$0xf0] }
  0x32   : > { %289 = vst [vmem:[#allocation2 + $0xd4] sm:$0xff] %v273_v35  ;;  %v3298_v61 = vor.u32 %v3011_v57, %v2604_v58  ;;  %v3014_v2 = vld [vmem:[#allocation2 + $0xa4] sm:$0xf]  ;;  %v3308_v8 = vor.u32 %v3013_v0, %v2610_v63  ;;  %v2622_v11 = vld [vmem:[#allocation2 + $0xa8] sm:$0xf] }
  0x33   : > { %4755 = vst [vmem:[#allocation11_spill] sm:$0xff] %v3272_v41  ;;  %v2690_v38 = vld [vmem:[#allocation2 + $0x4] sm:$0xf]  ;;  %v3032_v39 = vld [vmem:[#allocation2 + $0x10] sm:$0xf0] }
  0x34   : > { %4756 = vst [vmem:[#allocation12_spill] sm:$0xff] %v3274_v42  ;;  %510 = vrot.lane.b32.xlu2 %v3270_v40, %s3140_s25  ;;  %v2616_v3 = vld [vmem:[#allocation2 + $0xb0] sm:$0xf0]  ;;  %v3016_v12 = vld [vmem:[#allocation2 + $0xb4] sm:$0xf0] }
  0x35   : > { %290 = vst [vmem:[#allocation2 + $0xe4] sm:$0xff] %v274_v43  ;;  %v3310_v9 = vor.u32 %v3014_v2, %v2616_v3  ;;  %v3320_v18 = vor.u32 %v3016_v12, %v2622_v11  ;;  %v3031_v45 = vld [vmem:[#allocation2 + $0x8] sm:$0xf]  ;;  %v2692_v46 = vld [vmem:[#allocation2 + $0x14] sm:$0xf0] }
  0x36   : > { %514 = vrot.lane.b32.xlu1 %v3272_v41, %s3140_s25  ;;  %518 = vrot.lane.b32.xlu0 %v3274_v42, %s3140_s25  ;;  %291 = vst [vmem:[#allocation2 + $0xf4] sm:$0xff] %v275_v44  ;;  %v3430_v44 = vor.u32 %v3032_v39, %v2690_v38  ;;  %v3035_v48 = vld [vmem:[#allocation2 + $0x30] sm:$0xf0]  ;;  %v3444_v54 = vor.u32 %v3031_v45, %v2692_v46  ;;  %v3034_v59 = vld [vmem:[#allocation2 + $0x28] sm:$0xf] }
  0x37   : > { %4757 = vst [vmem:[#allocation13_spill] sm:$0xff] %v3284_v51  ;;  %v3017_v13 = vld [vmem:[#allocation2 + $0xc4] sm:$0xf]  ;;  %v2634_v21 = vld [vmem:[#allocation2 + $0xc8] sm:$0xf]  ;;  %v3446_v55 = vor.u32 %v3035_v48, %v2702_v47 }
  0x38   : > { %4758 = vst [vmem:[#allocation14_spill] sm:$0xff] %v3296_v60  ;;  %v2704_v63 = vld [vmem:[#allocation2 + $0x34] sm:$0xf0]  ;;  %v2714_v0 = vld [vmem:[#allocation2 + $0x44] sm:$0xf] }
  0x39   : > { %v2628_v15 = vld [vmem:[#allocation2 + $0xd0] sm:$0xf0]  ;;  %v3019_v22 = vld [vmem:[#allocation2 + $0xd4] sm:$0xf0]  ;;  %244 = vst.msk [vmem:[#allocation2 + $0xc] sm:$0xf] %vm243_vm1, %v3139_v1  ;;  %v3462_v11 = vor.u32 %v3034_v59, %v2704_v63 }
  0x3a   : > { %v3322_v19 = vor.u32 %v3017_v13, %v2628_v15  ;;  %v3332_v26 = vor.u32 %v3019_v22, %v2634_v21  ;;  %245 = vst.msk [vmem:[#allocation2 + $0x1c] sm:$0xf] %vm243_vm1, %v3139_v1  ;;  %v3038_v2 = vld [vmem:[#allocation2 + $0x50] sm:$0xf0]  ;;  %v3037_v17 = vld [vmem:[#allocation2 + $0x48] sm:$0xf] }
  0x3b   : > { %246 = vst.msk [vmem:[#allocation2 + $0x2c] sm:$0xf] %vm243_vm1, %v3139_v1  ;;  %v3464_v12 = vor.u32 %v3038_v2, %v2714_v0  ;;  %v2716_v21 = vld [vmem:[#allocation2 + $0x54] sm:$0xf0]  ;;  %v2726_v22 = vld [vmem:[#allocation2 + $0x64] sm:$0xf] }
  0x3c   : > { %516 = vrot.lane.b32.xlu2 %v3284_v51, %s3140_s25  ;;  %v3020_v23 = vld [vmem:[#allocation2 + $0xe4] sm:$0xf]  ;;  %v2646_v28 = vld [vmem:[#allocation2 + $0xe8] sm:$0xf]  ;;  %247 = vst.msk [vmem:[#allocation2 + $0x3c] sm:$0xf] %vm243_vm1, %v3139_v1  ;;  %v3480_v38 = vor.u32 %v3037_v17, %v2716_v21 }
  0x3d   : > { %v2640_v24 = vld [vmem:[#allocation2 + $0xf0] sm:$0xf0]  ;;  %v3022_v29 = vld [vmem:[#allocation2 + $0xf4] sm:$0xf0]  ;;  %248 = vst.msk [vmem:[#allocation2 + $0x4c] sm:$0xf] %vm243_vm1, %v3139_v1 }
  0x3e   : > { %520 = vrot.lane.b32.xlu1 %v3286_v52, %s3140_s25  ;;  %524 = vrot.lane.b32.xlu0 %v3288_v53, %s3140_s25  ;;  %v3334_v27 = vor.u32 %v3020_v23, %v2640_v24  ;;  %v3342_v32 = vor.u32 %v3022_v29, %v2646_v28  ;;  %249 = vst.msk [vmem:[#allocation2 + $0x5c] sm:$0xf] %vm243_vm1, %v3139_v1  ;;  %v3041_v23 = vld [vmem:[#allocation2 + $0x70] sm:$0xf0]  ;;  %v3040_v48 = vld [vmem:[#allocation2 + $0x68] sm:$0xf] }
  0x3f   : > { %250 = vst.msk [vmem:[#allocation2 + $0x6c] sm:$0xf] %vm243_vm1, %v3139_v1  ;;  %v3482_v39 = vor.u32 %v3041_v23, %v2726_v22  ;;  %v3044_v59 = vld [vmem:[#allocation2 + $0x90] sm:$0xf0]  ;;  %v3043_v23 = vld [vmem:[#allocation2 + $0x88] sm:$0xf] }
  0x40   : > { %251 = vst.msk [vmem:[#allocation2 + $0x7c] sm:$0xf] %vm243_vm1, %v3139_v1  ;;  %v2698_v56 = vld [vmem:[#allocation2 + $0xc] sm:$0xf] }
  0x41   : > { %252 = vst.msk [vmem:[#allocation2 + $0x8c] sm:$0xf] %vm243_vm1, %v3139_v1  ;;  %v3033_v57 = vld [vmem:[#allocation2 + $0x18] sm:$0xf0] }
  0x42   : > { %253 = vst.msk [vmem:[#allocation2 + $0x9c] sm:$0xf] %vm243_vm1, %v3139_v1  ;;  %v3458_v5 = vor.u32 %v3033_v57, %v2698_v56  ;;  %v2710_v13 = vld [vmem:[#allocation2 + $0x2c] sm:$0xf]  ;;  %v2728_v56 = vld [vmem:[#allocation2 + $0x74] sm:$0xf0] }
  0x43   : > { %254 = vst.msk [vmem:[#allocation2 + $0xac] sm:$0xf] %vm243_vm1, %v3139_v1  ;;  %v3036_v15 = vld [vmem:[#allocation2 + $0x38] sm:$0xf0]  ;;  %v2738_v57 = vld [vmem:[#allocation2 + $0x84] sm:$0xf] }
  0x44   : > { %522 = vrot.lane.b32.xlu2 %v3296_v60, %s3140_s25  ;;  %255 = vst.msk [vmem:[#allocation2 + $0xbc] sm:$0xf] %vm243_vm1, %v3139_v1  ;;  %v3476_v28 = vor.u32 %v3036_v15, %v2710_v13  ;;  %v2722_v45 = vld [vmem:[#allocation2 + $0x4c] sm:$0xf]  ;;  %v3498_v13 = vor.u32 %v3040_v48, %v2728_v56  ;;  %v3500_v15 = vor.u32 %v3044_v59, %v2738_v57 }
  0x45   : > { %256 = vst.msk [vmem:[#allocation2 + $0xcc] sm:$0xf] %vm243_vm1, %v3139_v1  ;;  %v3039_v46 = vld [vmem:[#allocation2 + $0x58] sm:$0xf0] }
  0x46   : > { %526 = vrot.lane.b32.xlu1 %v3298_v61, %s3140_s25  ;;  %530 = vrot.lane.b32.xlu0 %v3300_v62, %s3140_s25  ;;  %257 = vst.msk [vmem:[#allocation2 + $0xdc] sm:$0xf] %vm243_vm1, %v3139_v1  ;;  %v3494_v0 = vor.u32 %v3039_v46, %v2722_v45  ;;  %v2734_v17 = vld [vmem:[#allocation2 + $0x6c] sm:$0xf]  ;;  %v2740_v45 = vld [vmem:[#allocation2 + $0x94] sm:$0xf0] }
  0x47   : > { %258 = vst.msk [vmem:[#allocation2 + $0xec] sm:$0xf] %vm243_vm1, %v3139_v1  ;;  %v3042_v21 = vld [vmem:[#allocation2 + $0x78] sm:$0xf0]  ;;  %v2750_v46 = vld [vmem:[#allocation2 + $0xa4] sm:$0xf]  ;;  %v3510_v59 = vor.u32 %v3043_v23, %v2740_v45 }
  0x48   : > { %259 = vst.msk [vmem:[#allocation2 + $0xfc] sm:$0xf] %vm243_vm1, %v3139_v1  ;;  %v3508_v56 = vor.u32 %v3042_v21, %v2734_v17  ;;  %v2752_v17 = vld [vmem:[#allocation2 + $0xb4] sm:$0xf0]  ;;  %v2762_v21 = vld [vmem:[#allocation2 + $0xc4] sm:$0xf] }
  0x49   : > { %4759 = vst [vmem:[#allocation15_spill] sm:$0xff] %v3458_v5  ;;  %v3050_v23 = vld [vmem:[#allocation2 + $0xd0] sm:$0xf0] }
  0x4a   : > { %4760 = vst [vmem:[#allocation16_spill] sm:$0xff] %v3462_v11 }
  0x4b   : > { %4761 = vst [vmem:[#allocation17_spill] sm:$0xff] %v3464_v12 }
  0x4c   : > { %528 = vrot.lane.b32.xlu2 %v3308_v8, %s3140_s25  ;;  %4762 = vst [vmem:[#allocation18_spill] sm:$0xff] %v3476_v28 }
  0x4d   : > { %4763 = vst [vmem:[#allocation19_spill] sm:$0xff] %v3480_v38 }
  0x4e   : > { %532 = vrot.lane.b32.xlu1 %v3310_v9, %s3140_s25  ;;  %536 = vrot.lane.b32.xlu0 %v3312_v10, %s3140_s25  ;;  %4764 = vst [vmem:[#allocation20_spill] sm:$0xff] %v3482_v39 }
  0x4f   : > { %4765 = vst [vmem:[#allocation21_spill] sm:$0xff] %v3494_v0 }
  0x50   : > { %4766 = vst [vmem:[#allocation22_spill] sm:$0xff] %v3498_v13 }
  0x51   : > { %4767 = vst [vmem:[#allocation23_spill] sm:$0xff] %v3500_v15 }
  0x52   : > { %4768 = vst [vmem:[#allocation24_spill] sm:$0xff] %v3508_v56 }
  0x53   : > { %4769 = vst [vmem:[#allocation25_spill] sm:$0xff] %v3510_v59 }
  0x54   : > { %534 = vrot.lane.b32.xlu2 %v3320_v18, %s3140_s25 }
  0x56   : > { %538 = vrot.lane.b32.xlu1 %v3322_v19, %s3140_s25  ;;  %542 = vrot.lane.b32.xlu0 %v3324_v20, %s3140_s25 }
  0x5c   : > { %540 = vrot.lane.b32.xlu2 %v3332_v26, %s3140_s25 }
  0x5e   : > { %544 = vrot.lane.b32.xlu1 %v3334_v27, %s3140_s25  ;;  %663 = vrot.lane.b32.xlu0 %v3228_v7, %s3141_s26 }
  0x64   : > { %546 = vrot.lane.b32.xlu2 %v3342_v32, %s3140_s25 }
  0x66   : > { %665 = vrot.lane.b32.xlu1 %v3262_v31, %s3141_s26  ;;  %669 = vrot.lane.b32.xlu0 %v3213_v4, %s3141_s26 }
  0x6c   : > { %667 = vrot.lane.b32.xlu2 %v3260_v30, %s3141_s26 }
  0x6e   : > { %671 = vrot.lane.b32.xlu1 %v3256_v25, %s3141_s26  ;;  %675 = vrot.lane.b32.xlu0 %v3244_v14, %s3141_s26 }
  0x74   : > { %673 = vrot.lane.b32.xlu2 %v3270_v40, %s3141_s26 }
  0x76   : > { %677 = vrot.lane.b32.xlu1 %v3272_v41, %s3141_s26  ;;  %681 = vrot.lane.b32.xlu0 %v3274_v42, %s3141_s26 }
  0x7c   : > { %679 = vrot.lane.b32.xlu2 %v3284_v51, %s3141_s26 }
  0x7e   : > { %683 = vrot.lane.b32.xlu1 %v3286_v52, %s3141_s26  ;;  %687 = vrot.lane.b32.xlu0 %v3288_v53, %s3141_s26 }
  0x84   : > { %685 = vrot.lane.b32.xlu2 %v3296_v60, %s3141_s26 }
  0x86   : > { %689 = vrot.lane.b32.xlu1 %v3298_v61, %s3141_s26  ;;  %v3374_v33 = vpop.permute.xlu2 %508  ;;  %693 = vrot.lane.b32.xlu0 %v3300_v62, %s3141_s26 }
  0x8b   : > { %v3422_v36 = vpop.permute.xlu1 %506 }
  0x8c   : > { %691 = vrot.lane.b32.xlu2 %v3308_v8, %s3141_s26 }
  0x8d   : > { %v3406_v35 = vpop.permute.xlu0 %500 }
  0x8e   : > { %695 = vrot.lane.b32.xlu1 %v3310_v9, %s3141_s26  ;;  %v3398_v34 = vpop.permute.xlu2 %510  ;;  %699 = vrot.lane.b32.xlu0 %v3312_v10, %s3141_s26 }
  0x94   : > { %697 = vrot.lane.b32.xlu2 %v3320_v18, %s3141_s26 }
  0x95   : > { %v3428_v43 = vpop.permute.xlu0 %512 }
  0x96   : > { %701 = vrot.lane.b32.xlu1 %v3322_v19, %s3141_s26  ;;  %v3424_v37 = vpop.permute.xlu2 %516  ;;  %705 = vrot.lane.b32.xlu0 %v3324_v20, %s3141_s26 }
  0x9c   : > { %703 = vrot.lane.b32.xlu2 %v3332_v26, %s3141_s26 }
  0x9e   : > { %707 = vrot.lane.b32.xlu1 %v3334_v27, %s3141_s26  ;;  %v3436_v1 = vpop.permute.xlu2 %522  ;;  %971 = vrot.lane.b32.xlu0 %v3430_v44, %s3142_s27 }
  0xa0   : > { %v3440_v49 = vpop.permute.xlu1 %504  ;;  %v3442_v50 = vpop.permute.xlu0 %502 }
  0xa4   : > { %709 = vrot.lane.b32.xlu2 %v3342_v32, %s3141_s26 }
  0xa6   : > { %973 = vrot.lane.b32.xlu1 %v3444_v54, %s3142_s27  ;;  %v3452_v58 = vpop.permute.xlu2 %528  ;;  %977 = vrot.lane.b32.xlu0 %v3446_v55, %s3142_s27 }
  0xa8   : > { %v3456_v3 = vpop.permute.xlu1 %514  ;;  %v3460_v6 = vpop.permute.xlu0 %518 }
  0xac   : > { %975 = vrot.lane.b32.xlu2 %v3458_v5, %s3142_s27  ;;  %v3054_v5 = vld [vmem:[#allocation2 + $0xf8] sm:$0xf0] }
  0xae   : > { %979 = vrot.lane.b32.xlu1 %v3462_v11, %s3142_s27  ;;  %v3470_v16 = vpop.permute.xlu2 %534  ;;  %983 = vrot.lane.b32.xlu0 %v3464_v12, %s3142_s27 }
  0xb0   : > { %v3474_v24 = vpop.permute.xlu1 %520  ;;  %v3478_v29 = vpop.permute.xlu0 %524 }
  0xb4   : > { %981 = vrot.lane.b32.xlu2 %v3476_v28, %s3142_s27  ;;  %v3046_v28 = vld [vmem:[#allocation2 + $0xa8] sm:$0xf] }
  0xb5   : > { %v3524_v12 = vor.u32 %v3046_v28, %v2752_v17 }
  0xb6   : > { %985 = vrot.lane.b32.xlu1 %v3480_v38, %s3142_s27  ;;  %v3488_v47 = vpop.permute.xlu2 %540  ;;  %989 = vrot.lane.b32.xlu0 %v3482_v39, %s3142_s27  ;;  %v3047_v39 = vld [vmem:[#allocation2 + $0xb0] sm:$0xf0]  ;;  %v3045_v38 = vld [vmem:[#allocation2 + $0x98] sm:$0xf0] }
  0xb7   : > { %4773 = vst [vmem:[#allocation29_spill] sm:$0xff] %v3524_v12 }
  0xb8   : > { %v3492_v63 = vpop.permute.xlu1 %526  ;;  %v3496_v2 = vpop.permute.xlu0 %530 }
  0xbc   : > { %987 = vrot.lane.b32.xlu2 %v3494_v0, %s3142_s27  ;;  %v3512_v0 = vor.u32 %v3047_v39, %v2750_v46 }
  0xbe   : > { %991 = vrot.lane.b32.xlu1 %v3498_v13, %s3142_s27  ;;  %v547_v22 = vpop.permute.xlu2 %546  ;;  %995 = vrot.lane.b32.xlu0 %v3500_v15, %s3142_s27  ;;  %4770 = vst [vmem:[#allocation26_spill] sm:$0xff] %v3512_v0  ;;  %v2746_v13 = vld [vmem:[#allocation2 + $0x8c] sm:$0xf] }
  0xbf   : > { %v3522_v39 = vor.u32 %v3045_v38, %v2746_v13  ;;  %v3049_v38 = vld [vmem:[#allocation2 + $0xc8] sm:$0xf]  ;;  %v2764_v13 = vld [vmem:[#allocation2 + $0xd4] sm:$0xf0] }
  0xc0   : > { %v533_v48 = vpop.permute.xlu1 %532  ;;  %v537_v57 = vpop.permute.xlu0 %536 }
  0xc1   : > { %4772 = vst [vmem:[#allocation28_spill] sm:$0xff] %v3522_v39 }
  0xc4   : > { %993 = vrot.lane.b32.xlu2 %v3508_v56, %s3142_s27  ;;  %v3526_v56 = vor.u32 %v3050_v23, %v2762_v21 }
  0xc6   : > { %997 = vrot.lane.b32.xlu1 %v3510_v59, %s3142_s27  ;;  %v3518_v15 = vpop.permute.xlu2 %667  ;;  %1001 = vrot.lane.b32.xlu0 %v3512_v0, %s3142_s27  ;;  %4774 = vst [vmem:[#allocation30_spill] sm:$0xff] %v3526_v56  ;;  %v2758_v59 = vld [vmem:[#allocation2 + $0xac] sm:$0xf] }
  0xc7   : > { %4771 = vst [vmem:[#allocation27_spill] sm:$0xff] %v3518_v15  ;;  %v3048_v15 = vld [vmem:[#allocation2 + $0xb8] sm:$0xf0] }
  0xc8   : > { %v539_v45 = vpop.permute.xlu1 %538  ;;  %v543_v46 = vpop.permute.xlu0 %542  ;;  %v3536_v28 = vor.u32 %v3048_v15, %v2758_v59  ;;  %v3052_v59 = vld [vmem:[#allocation2 + $0xe8] sm:$0xf] }
  0xc9   : > { %v561_v15 = vsel %vm548_vm2, %v537_v57, %v539_v45 }
  0xca   : > { %4775 = vst [vmem:[#allocation31_spill] sm:$0xff] %v3536_v28 }
  0xcc   : > { %999 = vrot.lane.b32.xlu2 %v3522_v39, %s3142_s27  ;;  %v2782_v39 = vld [vmem:[#allocation2 + $0xec] sm:$0xf] }
  0xce   : > { %1003 = vrot.lane.b32.xlu1 %v3524_v12, %s3142_s27  ;;  %v3532_v0 = vpop.permute.xlu2 %673  ;;  %1007 = vrot.lane.b32.xlu0 %v3526_v56, %s3142_s27  ;;  %v3542_v12 = vor.u32 %v3049_v38, %v2764_v13  ;;  %v3546_v56 = vor.u32 %v3054_v5, %v2782_v39  ;;  %v3053_v38 = vld [vmem:[#allocation2 + $0xf0] sm:$0xf0] }
  0xd0   : > { %v545_v11 = vpop.permute.xlu1 %544  ;;  %v3538_v17 = vpop.permute.xlu0 %663 }
  0xd1   : > { %4776 = vst [vmem:[#allocation32_spill] sm:$0xff] %v3538_v17  ;;  %v563_v21 = vsel %vm548_vm2, %v543_v46, %v545_v11  ;;  %v564_v23 = vsel %vm548_vm2, %v545_v11, %v547_v22  ;;  %v2776_v17 = vld [vmem:[#allocation2 + $0xf4] sm:$0xf0]  ;;  %v562_v11 = vsel %vm548_vm2, %v539_v45, %v3488_v47  ;;  %v2774_v46 = vld [vmem:[#allocation2 + $0xe4] sm:$0xf]  ;;  %v559_v47 = vsel %vm548_vm2, %v3496_v2, %v533_v48 }
  0xd2   : > { %581 = vmatpush.bf16.msra.mxu0 %v563_v21  ;;  %3095 = vmatpush.bf16.msra.mxu2 %v563_v21  ;;  %v3557_v39 = vor.u32 %v3052_v59, %v2776_v17  ;;  %v560_v45 = vsel %vm548_vm2, %v533_v48, %v3470_v16  ;;  %v3567_v13 = vor.u32 %v3053_v38, %v2774_v46  ;;  %v2770_v21 = vld [vmem:[#allocation2 + $0xcc] sm:$0xf] }
  0xd3   : > { %610 = vmatpush.bf16.msra.mxu1 %v564_v23  ;;  %3103 = vmatpush.bf16.msra.mxu3 %v564_v23  ;;  %v557_v17 = vsel %vm548_vm2, %v3478_v29, %v3492_v63  ;;  %v3051_v23 = vld [vmem:[#allocation2 + $0xd8] sm:$0xf0]  ;;  %v558_v2 = vsel %vm548_vm2, %v3492_v63, %v3452_v58  ;;  %v555_v58 = vsel %vm548_vm2, %v3460_v6, %v3474_v24 }
  0xd4   : > { %1005 = vrot.lane.b32.xlu2 %v3536_v28, %s3142_s27  ;;  %v556_v63 = vsel %vm548_vm2, %v3474_v24, %v3436_v1  ;;  %v553_v59 = vsel %vm548_vm2, %v3428_v43, %v3456_v3  ;;  %v552_v43 = vsel %vm548_vm2, %v3374_v33, %v3398_v34 }
  0xd6   : > { %1009 = vrot.lane.b32.xlu1 %v3542_v12, %s3142_s27  ;;  %582 = vmatpush.bf16.msra.mxu0 %v561_v15  ;;  %v3553_v22 = vpop.permute.xlu2 %679 }
  0xd7   : > { %611 = vmatpush.bf16.msra.mxu1 %v562_v11  ;;  %3104 = vmatpush.bf16.msra.mxu3 %v562_v11  ;;  %v554_v11 = vsel %vm548_vm2, %v3456_v3, %v3424_v37  ;;  %v551_v37 = vsel %vm548_vm2, %v3422_v36, %v3374_v33  ;;  %v549_v3 = vsel %vm548_vm2, %v3406_v35, %v3442_v50 }
  0xd8   : > { %3096 = vmatpush.bf16.msra.mxu2 %v561_v15  ;;  %v3555_v5 = vpop.permute.xlu1 %665  ;;  %1017 = vrot.lane.b32.xlu0 %v3546_v56, %s3142_s27  ;;  %v3561_v57 = vpop.permute.xlu0 %669  ;;  %v3583_v15 = vor.u32 %v3051_v23, %v2770_v21  ;;  %v550_v36 = vsel %vm548_vm2, %v3442_v50, %v3440_v49 }
  0xda   : > { %583 = vmatpush.bf16.msra.mxu0 %v559_v47 }
  0xdb   : > { %612 = vmatpush.bf16.msra.mxu1 %v560_v45  ;;  %3105 = vmatpush.bf16.msra.mxu3 %v560_v45 }
  0xdc   : > { %3097 = vmatpush.bf16.msra.mxu2 %v559_v47  ;;  %1015 = vrot.lane.b32.xlu2 %v3557_v39, %s3142_s27 }
  0xde   : > { %1013 = vrot.lane.b32.xlu1 %v3567_v13, %s3142_s27  ;;  %584 = vmatpush.bf16.msra.mxu0 %v557_v17  ;;  %v3579_v16 = vpop.permute.xlu2 %685 }
  0xdf   : > { %613 = vmatpush.bf16.msra.mxu1 %v558_v2  ;;  %3106 = vmatpush.bf16.msra.mxu3 %v558_v2 }
  0xe0   : > { %3098 = vmatpush.bf16.msra.mxu2 %v557_v17  ;;  %v3581_v48 = vpop.permute.xlu1 %671  ;;  %1346 = vrot.lane.b32.xlu0 %v3228_v7, %s3143_s28  ;;  %v3587_v29 = vpop.permute.xlu0 %675 }
  0xe2   : > { %585 = vmatpush.bf16.msra.mxu0 %v555_v58 }
  0xe3   : > { %614 = vmatpush.bf16.msra.mxu1 %v556_v63  ;;  %3107 = vmatpush.bf16.msra.mxu3 %v556_v63 }
  0xe4   : > { %3099 = vmatpush.bf16.msra.mxu2 %v555_v58  ;;  %1011 = vrot.lane.b32.xlu2 %v3583_v15, %s3142_s27 }
  0xe6   : > { %1348 = vrot.lane.b32.xlu1 %v3262_v31, %s3143_s28  ;;  %586 = vmatpush.bf16.msra.mxu0 %v553_v59  ;;  %v3605_v6 = vpop.permute.xlu2 %691  ;;  %v2995_v31 = vld [vmem:[%s4691_s1] sm:$0xff] }
  0xe7   : > { %615 = vmatpush.bf16.msra.mxu1 %v554_v11  ;;  %3108 = vmatpush.bf16.msra.mxu3 %v554_v11 }
  0xe8   : > { %3100 = vmatpush.bf16.msra.mxu2 %v553_v59  ;;  %v3607_v1 = vpop.permute.xlu1 %677  ;;  %1352 = vrot.lane.b32.xlu0 %v3213_v4, %s3143_s28  ;;  %v3611_v24 = vpop.permute.xlu0 %681 }
  0xea   : > { %587 = vmatpush.bf16.msra.mxu0 %v551_v37 }
  0xeb   : > { %616 = vmatpush.bf16.msra.mxu1 %v552_v43  ;;  %3109 = vmatpush.bf16.msra.mxu3 %v552_v43 }
  0xec   : > { %3101 = vmatpush.bf16.msra.mxu2 %v551_v37  ;;  %1350 = vrot.lane.b32.xlu2 %v3260_v30, %s3143_s28 }
  0xee   : > { %1354 = vrot.lane.b32.xlu1 %v3256_v25, %s3143_s28  ;;  %588 = vmatpush.bf16.msra.mxu0 %v549_v3  ;;  %v698_v46 = vpop.permute.xlu2 %697 }
  0xef   : > { %617 = vmatpush.bf16.msra.mxu1 %v550_v36  ;;  %3110 = vmatpush.bf16.msra.mxu3 %v550_v36 }
  0xf0   : > { %3102 = vmatpush.bf16.msra.mxu2 %v549_v3  ;;  %v684_v33 = vpop.permute.xlu1 %683  ;;  %1358 = vrot.lane.b32.xlu0 %v3244_v14, %s3143_s28  ;;  %v688_v34 = vpop.permute.xlu0 %687 }
  0xf4   : > { %1356 = vrot.lane.b32.xlu2 %v3270_v40, %s3143_s28  ;;  %v3023_v40 = vld [vmem:[%s4691_s1 + $0x60] sm:$0xff] }
  0xf5   : > { %618 = vmatmul.bf16.vlgmr.msra.gmra.mxu1 %v3023_v40  ;;  %589 = vmatmul.bf16.vlgmr.msra.gmra.mxu0 %v3023_v40 }
  0xf6   : > { %1360 = vrot.lane.b32.xlu1 %v3272_v41, %s3143_s28  ;;  %v704_v35 = vpop.permute.xlu2 %703 }
  0xf8   : > { %v690_v38 = vpop.permute.xlu1 %689  ;;  %1364 = vrot.lane.b32.xlu0 %v3274_v42, %s3143_s28  ;;  %v694_v49 = vpop.permute.xlu0 %693  ;;  %v4789_v42 = vld [vmem:[#allocation30_spill] sm:$0xff] }
  0xfc   : > { %1362 = vrot.lane.b32.xlu2 %v3284_v51, %s3143_s28 }
  0xfe   : > { %1366 = vrot.lane.b32.xlu1 %v3286_v52, %s3143_s28  ;;  %v710_v50 = vpop.permute.xlu2 %709 }
 0x100   : > { %v696_v47 = vpop.permute.xlu1 %695  ;;  %1370 = vrot.lane.b32.xlu0 %v3288_v53, %s3143_s28  ;;  %v700_v45 = vpop.permute.xlu0 %699 }
 0x104   : > { %1368 = vrot.lane.b32.xlu2 %v3296_v60, %s3143_s28 }
 0x106   : > { %1372 = vrot.lane.b32.xlu1 %v3298_v61, %s3143_s28  ;;  %v3647_v17 = vpop.permute.xlu2 %975 }
 0x108   : > { %v702_v21 = vpop.permute.xlu1 %701  ;;  %1376 = vrot.lane.b32.xlu0 %v3300_v62, %s3143_s28  ;;  %v706_v23 = vpop.permute.xlu0 %705 }
 0x109   : > { %v724_v37 = vsel %vm711_vm3, %v700_v45, %v702_v21  ;;  %v725_v43 = vsel %vm711_vm3, %v702_v21, %v704_v35  ;;  %v723_v45 = vsel %vm711_vm3, %v696_v47, %v698_v46  ;;  %v720_v35 = vsel %vm711_vm3, %v688_v34, %v690_v38 }
 0x10a   : > { %v721_v21 = vsel %vm711_vm3, %v690_v38, %v3605_v6  ;;  %v718_v34 = vsel %vm711_vm3, %v3611_v24, %v684_v33  ;;  %v716_v6 = vsel %vm711_vm3, %v3587_v29, %v3607_v1  ;;  %v717_v24 = vsel %vm711_vm3, %v3607_v1, %v3553_v22  ;;  %v3025_v29 = vld [vmem:[%s4691_s1 + $0x70] sm:$0xff]  ;;  %v4777_v1 = vld [vmem:[#allocation15_spill] sm:$0xff] }
 0x10b   : > { %v715_v22 = vsel %vm711_vm3, %v3581_v48, %v3532_v0  ;;  %628 = vmatmul.bf16.vlgmr.msra.gmra.mxu3 %v3025_v29  ;;  %599 = vmatmul.bf16.vlgmr.msra.gmra.mxu2 %v3025_v29  ;;  %v3026_v29 = vld [vmem:[%s4691_s1 + $0x78] sm:$0xff] }
 0x10c   : > { %1374 = vrot.lane.b32.xlu2 %v3308_v8, %s3143_s28 }
 0x10e   : > { %1378 = vrot.lane.b32.xlu1 %v3310_v9, %s3143_s28  ;;  %v3655_v2 = vpop.permute.xlu2 %981 }
 0x110   : > { %v708_v58 = vpop.permute.xlu1 %707  ;;  %1392 = vrot.lane.b32.xlu0 %v3342_v32, %s3143_s28  ;;  %v3659_v63 = vpop.permute.xlu0 %971 }
 0x111   : > { %v726_v59 = vsel %vm711_vm3, %v706_v23, %v708_v58  ;;  %v727_v11 = vsel %vm711_vm3, %v708_v58, %v710_v50  ;;  %v722_v23 = vsel %vm711_vm3, %v694_v49, %v696_v47  ;;  %v719_v47 = vsel %vm711_vm3, %v684_v33, %v3579_v16 }
 0x112   : > { %744 = vmatpush.bf16.msrb.mxu2 %v726_v59  ;;  %773 = vmatpush.bf16.msrb.mxu3 %v727_v11  ;;  %v714_v59 = vsel %vm711_vm3, %v3561_v57, %v3581_v48  ;;  %v4778_v11 = vld [vmem:[#allocation32_spill] sm:$0xff]  ;;  %v4780_v57 = vld [vmem:[#allocation27_spill] sm:$0xff]  ;;  %v4781_v48 = vld [vmem:[#allocation17_spill] sm:$0xff] }
 0x114   : > { %1390 = vrot.lane.b32.xlu2 %v3334_v27, %s3143_s28 }
 0x116   : > { %1388 = vrot.lane.b32.xlu1 %v3324_v20, %s3143_s28  ;;  %745 = vmatpush.bf16.msrb.mxu2 %v724_v37  ;;  %v3669_v3 = vpop.permute.xlu2 %987  ;;  %v712_v37 = vsel %vm711_vm3, %v4778_v11, %v3555_v5 }
 0x117   : > { %774 = vmatpush.bf16.msrb.mxu3 %v725_v43  ;;  %v4779_v43 = vld [vmem:[#allocation16_spill] sm:$0xff] }
 0x118   : > { %v3671_v36 = vpop.permute.xlu1 %973  ;;  %1386 = vrot.lane.b32.xlu0 %v3332_v26, %s3143_s28  ;;  %v3675_v50 = vpop.permute.xlu0 %977 }
 0x11a   : > { %746 = vmatpush.bf16.msrb.mxu2 %v722_v23  ;;  %v713_v23 = vsel %vm711_vm3, %v3555_v5, %v4780_v57 }
 0x11b   : > { %775 = vmatpush.bf16.msrb.mxu3 %v723_v45  ;;  %604 = vmatmul.bf16.gmra.mxu2 %v3026_v29 }
 0x11c   : > { %1384 = vrot.lane.b32.xlu2 %v3322_v19, %s3143_s28  ;;  %633 = vmatmul.bf16.gmra.mxu3 %v3026_v29 }
 0x11e   : > { %1382 = vrot.lane.b32.xlu1 %v3312_v10, %s3143_s28  ;;  %747 = vmatpush.bf16.msrb.mxu2 %v720_v35  ;;  %v3686_v58 = vpop.permute.xlu2 %993 }
 0x11f   : > { %776 = vmatpush.bf16.msrb.mxu3 %v721_v21  ;;  %v4782_v21 = vld [vmem:[#allocation18_spill] sm:$0xff] }
 0x120   : > { %v3688_v49 = vpop.permute.xlu1 %979  ;;  %1518 = vrot.lane.b32.xlu0 %v3430_v44, %s3144_s29  ;;  %v3692_v46 = vpop.permute.xlu0 %983 }
 0x122   : > { %748 = vmatpush.bf16.msrb.mxu2 %v718_v34  ;;  %v4783_v34 = vld [vmem:[#allocation19_spill] sm:$0xff] }
 0x123   : > { %777 = vmatpush.bf16.msrb.mxu3 %v719_v47 }
 0x124   : > { %1380 = vrot.lane.b32.xlu2 %v3320_v18, %s3143_s28 }
 0x126   : > { %1520 = vrot.lane.b32.xlu1 %v3444_v54, %s3144_s29  ;;  %749 = vmatpush.bf16.msrb.mxu2 %v716_v6  ;;  %v3708_v38 = vpop.permute.xlu2 %999 }
 0x127   : > { %778 = vmatpush.bf16.msrb.mxu3 %v717_v24  ;;  %v4784_v24 = vld [vmem:[#allocation20_spill] sm:$0xff] }
 0x128   : > { %v3710_v16 = vpop.permute.xlu1 %985  ;;  %1524 = vrot.lane.b32.xlu0 %v3446_v55, %s3144_s29  ;;  %v3714_v33 = vpop.permute.xlu0 %989 }
 0x12a   : > { %750 = vmatpush.bf16.msrb.mxu2 %v714_v59  ;;  %v4785_v59 = vld [vmem:[#allocation21_spill] sm:$0xff] }
 0x12b   : > { %779 = vmatpush.bf16.msrb.mxu3 %v715_v22  ;;  %v4786_v22 = vld [vmem:[#allocation22_spill] sm:$0xff] }
 0x12c   : > { %1522 = vrot.lane.b32.xlu2 %v4777_v1, %s3144_s29 }
 0x12e   : > { %1526 = vrot.lane.b32.xlu1 %v4779_v43, %s3144_s29  ;;  %751 = vmatpush.bf16.msrb.mxu2 %v712_v37  ;;  %v1006_v45 = vpop.permute.xlu2 %1005 }
 0x12f   : > { %780 = vmatpush.bf16.msrb.mxu3 %v713_v23  ;;  %v4787_v23 = vld [vmem:[#allocation24_spill] sm:$0xff] }
 0x130   : > { %v3735_v0 = vpop.permute.xlu1 %991  ;;  %1530 = vrot.lane.b32.xlu0 %v4781_v48, %s3144_s29  ;;  %v3739_v35 = vpop.permute.xlu0 %995 }
 0x131   : > { %752 = vmatmul.bf16.vlgmr.msrb.gmra.mxu2 %v2995_v31 }
 0x132   : > { %781 = vmatmul.bf16.vlgmr.msrb.gmra.mxu3 %v2995_v31 }
 0x134   : > { %1528 = vrot.lane.b32.xlu2 %v4782_v21, %s3144_s29 }
 0x136   : > { %1532 = vrot.lane.b32.xlu1 %v4783_v34, %s3144_s29  ;;  %v1016_v47 = vpop.permute.xlu2 %1015 }
 0x138   : > { %v998_v6 = vpop.permute.xlu1 %997  ;;  %1536 = vrot.lane.b32.xlu0 %v4784_v24, %s3144_s29  ;;  %v1002_v5 = vpop.permute.xlu0 %1001 }
 0x13c   : > { %1534 = vrot.lane.b32.xlu2 %v4785_v59, %s3144_s29 }
 0x13e   : > { %1538 = vrot.lane.b32.xlu1 %v4786_v22, %s3144_s29  ;;  %v1012_v11 = vpop.permute.xlu2 %1011 }
 0x140   : > { %v1004_v37 = vpop.permute.xlu1 %1003  ;;  %1562 = vrot.lane.b32.xlu0 %v3557_v39, %s3144_s29  ;;  %v1008_v57 = vpop.permute.xlu0 %1007 }
 0x141   : > { %v1031_v31 = vsel %vm1019_vm4, %v1004_v37, %v1006_v45  ;;  %v1030_v45 = vsel %vm1019_vm4, %v1002_v5, %v1004_v37  ;;  %v1028_v5 = vsel %vm1019_vm4, %v3739_v35, %v998_v6  ;;  %v4791_v35 = vld [vmem:[#allocation25_spill] sm:$0xff] }
 0x144   : > { %1540 = vrot.lane.b32.xlu2 %v4787_v23, %s3144_s29 }
 0x146   : > { %1564 = vrot.lane.b32.xlu1 %v3546_v56, %s3144_s29  ;;  %v1351_v7 = vpop.permute.xlu2 %1350 }
 0x148   : > { %v1010_v30 = vpop.permute.xlu1 %1009  ;;  %1556 = vrot.lane.b32.xlu0 %v3542_v12, %s3144_s29 }
 0x149   : > { %v1033_v14 = vsel %vm1019_vm4, %v1010_v30, %v1012_v11  ;;  %v1032_v60 = vsel %vm1019_vm4, %v1008_v57, %v1010_v30  ;;  %v2996_v30 = vld [vmem:[%s4691_s1 + $0x8] sm:$0xff]  ;;  %v1027_v11 = vsel %vm1019_vm4, %v3735_v0, %v3686_v58  ;;  %v1025_v58 = vsel %vm1019_vm4, %v3710_v16, %v3669_v3 }
 0x14a   : > { %v1018_v29 = vpop.permute.xlu0 %1017  ;;  %786 = vmatmul.bf16.gmra.mxu3 %v2996_v30  ;;  %757 = vmatmul.bf16.gmra.mxu2 %v2996_v30  ;;  %v1023_v3 = vsel %vm1019_vm4, %v3688_v49, %v3655_v2  ;;  %v1022_v2 = vsel %vm1019_vm4, %v3675_v50, %v3688_v49  ;;  %v3077_v30 = vld [vmem:[#allocation2 + $0xe8] sm:$0xf]  ;;  %v3027_v50 = vld [vmem:[%s4691_s1 + $0xc0] sm:$0xff] }
 0x14b   : > { %v1035_v4 = vsel %vm1019_vm4, %v1016_v47, %v1018_v29  ;;  %v4793_v49 = vld [vmem:[#allocation23_spill] sm:$0xff] }
 0x14c   : > { %1081 = vmatpush.bf16.msrb.mxu1 %v1035_v4  ;;  %1560 = vrot.lane.b32.xlu2 %v3567_v13, %s3144_s29  ;;  %v4788_v4 = vld [vmem:[#allocation29_spill] sm:$0xff] }
 0x14e   : > { %1558 = vrot.lane.b32.xlu1 %v3583_v15, %s3144_s29  ;;  %v3773_v25 = vpop.permute.xlu2 %1356 }
 0x150   : > { %v1014_v29 = vpop.permute.xlu1 %1013  ;;  %1550 = vrot.lane.b32.xlu0 %v4788_v4, %s3144_s29  ;;  %1082 = vmatpush.bf16.msrb.mxu1 %v1033_v14  ;;  %v1029_v14 = vsel %vm1019_vm4, %v998_v6, %v3708_v38  ;;  %v1026_v6 = vsel %vm1019_vm4, %v3714_v33, %v3735_v0  ;;  %v4792_v33 = vld [vmem:[#allocation28_spill] sm:$0xff] }
 0x151   : > { %v1034_v51 = vsel %vm1019_vm4, %v1014_v29, %v1016_v47 }
 0x152   : > { %1052 = vmatpush.bf16.msrb.mxu0 %v1034_v51  ;;  %v1347_v41 = vpop.permute.xlu0 %1346 }
 0x154   : > { %1083 = vmatpush.bf16.msrb.mxu1 %v1031_v31  ;;  %1554 = vrot.lane.b32.xlu2 %v4789_v42, %s3144_s29 }
 0x156   : > { %1552 = vrot.lane.b32.xlu1 %v3536_v28, %s3144_s29  ;;  %1053 = vmatpush.bf16.msrb.mxu0 %v1032_v60  ;;  %v3785_v40 = vpop.permute.xlu2 %1362 }
 0x158   : > { %v1349_v51 = vpop.permute.xlu1 %1348  ;;  %1761 = vrot.lane.b32.xlu0 %v3546_v56, %s3145_s13  ;;  %1084 = vmatpush.bf16.msrb.mxu1 %v1029_v14  ;;  %v1024_v14 = vsel %vm1019_vm4, %v3692_v46, %v3710_v16  ;;  %v2997_v16 = vld [vmem:[%s4691_s1 + $0x10] sm:$0xff] }
 0x159   : > { %v3796_v60 = vsel %vm1394_vm5, %v1347_v41, %v1349_v51  ;;  %v3799_v47 = vsel %vm1394_vm5, %v1349_v51, %v1351_v7  ;;  %v3024_v41 = vld [vmem:[%s4691_s1 + $0x68] sm:$0xff]  ;;  %v4790_v7 = vld [vmem:[#allocation26_spill] sm:$0xff]  ;;  %v1021_v51 = vsel %vm1019_vm4, %v3671_v36, %v3647_v17  ;;  %v1020_v17 = vsel %vm1019_vm4, %v3659_v63, %v3671_v36 }
 0x15a   : > { %1054 = vmatpush.bf16.msrb.mxu0 %v1030_v45  ;;  %v1353_v38 = vpop.permute.xlu0 %1352  ;;  %623 = vmatmul.bf16.gmra.mxu1 %v3024_v41  ;;  %v3075_v63 = vld [vmem:[#allocation2 + $0xc8] sm:$0xf]  ;;  %v2868_v36 = vld [vmem:[#allocation2 + $0xd4] sm:$0xf0] }
 0x15b   : > { %594 = vmatmul.bf16.gmra.mxu0 %v3024_v41  ;;  %791 = vmatmul.bf16.gmra.mxu3 %v2997_v16 }
 0x15c   : > { %1085 = vmatpush.bf16.msrb.mxu1 %v1027_v11  ;;  %1759 = vrot.lane.b32.xlu2 %v3557_v39, %s3145_s13 }
 0x15d   : > { %762 = vmatmul.bf16.gmra.mxu2 %v2997_v16 }
 0x15e   : > { %1548 = vrot.lane.b32.xlu1 %v4790_v7, %s3144_s29  ;;  %1055 = vmatpush.bf16.msrb.mxu0 %v1028_v5  ;;  %v3813_v37 = vpop.permute.xlu2 %1368 }
 0x160   : > { %v3818_v57 = vpop.permute.xlu1 %1354  ;;  %1544 = vrot.lane.b32.xlu0 %v4791_v35, %s3144_s29  ;;  %1086 = vmatpush.bf16.msrb.mxu1 %v1025_v58  ;;  %v2871_v58 = vor.u32 %v3075_v63, %v2868_v36  ;;  %v3071_v63 = vld [vmem:[#allocation2 + $0x88] sm:$0xf] }
 0x161   : > { %v3827_v29 = vsel %vm1394_vm5, %v1353_v38, %v3818_v57  ;;  %v2876_v38 = vld [vmem:[#allocation2 + $0xf4] sm:$0xf0] }
 0x162   : > { %1056 = vmatpush.bf16.msrb.mxu0 %v1026_v6  ;;  %v3829_v31 = vpop.permute.xlu0 %1358  ;;  %v2879_v5 = vor.u32 %v3077_v30, %v2876_v38 }
 0x164   : > { %1087 = vmatpush.bf16.msrb.mxu1 %v1023_v3  ;;  %1757 = vrot.lane.b32.xlu2 %v3567_v13, %s3145_s13  ;;  %v2874_v3 = vld [vmem:[#allocation2 + $0xe4] sm:$0xf] }
 0x165   : > { %1293 = vmatpush.bf16.msra.mxu3 %v2879_v5  ;;  %v3076_v5 = vld [vmem:[#allocation2 + $0xd0] sm:$0xf0] }
 0x166   : > { %1546 = vrot.lane.b32.xlu1 %v4792_v33, %s3144_s29  ;;  %1057 = vmatpush.bf16.msrb.mxu0 %v1024_v14  ;;  %v3841_v0 = vpop.permute.xlu2 %1374  ;;  %v3078_v14 = vld [vmem:[#allocation2 + $0xf0] sm:$0xf0] }
 0x167   : > { %v2875_v16 = vor.u32 %v3078_v14, %v2874_v3  ;;  %v2998_v3 = vld [vmem:[%s4691_s1 + $0x18] sm:$0xff]  ;;  %v2858_v14 = vld [vmem:[#allocation2 + $0xa4] sm:$0xf] }
 0x168   : > { %v3846_v45 = vpop.permute.xlu1 %1360  ;;  %1755 = vrot.lane.b32.xlu0 %v3583_v15, %s3145_s13  ;;  %1088 = vmatpush.bf16.msrb.mxu1 %v1021_v51  ;;  %v3073_v51 = vld [vmem:[#allocation2 + $0xa8] sm:$0xf] }
 0x169   : > { %1294 = vmatpush.bf16.msra.mxu3 %v2871_v58  ;;  %1264 = vmatpush.bf16.msra.mxu2 %v2875_v16  ;;  %v2852_v58 = vld [vmem:[#allocation2 + $0x94] sm:$0xf0]  ;;  %v3069_v16 = vld [vmem:[#allocation2 + $0x68] sm:$0xf] }
 0x16a   : > { %1058 = vmatpush.bf16.msrb.mxu0 %v1022_v2  ;;  %v3853_v46 = vpop.permute.xlu0 %1364 }
 0x16b   : > { %1089 = vmatmul.bf16.vlgmr.msrb.gmra.mxu1 %v3027_v50  ;;  %796 = vmatmul.bf16.gmra.mxu3 %v2998_v3 }
 0x16c   : > { %1753 = vrot.lane.b32.xlu2 %v3542_v12, %s3145_s13 }
 0x16d   : > { %767 = vmatmul.bf16.gmra.mxu2 %v2998_v3  ;;  %v2836_v3 = vld [vmem:[#allocation2 + $0x54] sm:$0xf0] }
 0x16e   : > { %1542 = vrot.lane.b32.xlu1 %v4793_v49, %s3144_s29  ;;  %1059 = vmatpush.bf16.msrb.mxu0 %v1020_v17  ;;  %v3868_v11 = vpop.permute.xlu2 %1390  ;;  %v2860_v17 = vld [vmem:[#allocation2 + $0xb4] sm:$0xf0] }
 0x16f   : > { %v2863_v30 = vor.u32 %v3073_v51, %v2860_v17  ;;  %v3074_v51 = vld [vmem:[#allocation2 + $0xb0] sm:$0xf0] }
 0x170   : > { %v3870_v41 = vpop.permute.xlu1 %1366  ;;  %1747 = vrot.lane.b32.xlu0 %v4788_v4, %s3145_s13 }
 0x171   : > { %1060 = vmatmul.bf16.vlgmr.msrb.gmra.mxu0 %v3027_v50  ;;  %v2866_v50 = vld [vmem:[#allocation2 + $0xc4] sm:$0xf]  ;;  %1295 = vmatpush.bf16.msra.mxu3 %v2863_v30  ;;  %v2859_v30 = vor.u32 %v3074_v51, %v2858_v14 }
 0x172   : > { %v3874_v6 = vpop.permute.xlu0 %1370  ;;  %v2867_v36 = vor.u32 %v3076_v5, %v2866_v50  ;;  %v2844_v50 = vld [vmem:[#allocation2 + $0x74] sm:$0xf0]  ;;  %v3028_v5 = vld [vmem:[%s4691_s1 + $0xc8] sm:$0xff] }
 0x174   : > { %1751 = vrot.lane.b32.xlu2 %v4789_v42, %s3145_s13  ;;  %1265 = vmatpush.bf16.msra.mxu2 %v2867_v36  ;;  %v3072_v36 = vld [vmem:[#allocation2 + $0x90] sm:$0xf0] }
 0x176   : > { %1749 = vrot.lane.b32.xlu1 %v3536_v28, %s3145_s13  ;;  %v3880_v2 = vpop.permute.xlu2 %1384  ;;  %v2855_v28 = vor.u32 %v3071_v63, %v2852_v58  ;;  %v2847_v63 = vor.u32 %v3069_v16, %v2844_v50  ;;  %v2842_v16 = vld [vmem:[#allocation2 + $0x64] sm:$0xf]  ;;  %v3065_v50 = vld [vmem:[#allocation2 + $0x28] sm:$0xf] }
 0x178   : > { %v3882_v38 = vpop.permute.xlu1 %1372  ;;  %1741 = vrot.lane.b32.xlu0 %v4791_v35, %s3145_s13  ;;  %1296 = vmatpush.bf16.msra.mxu3 %v2855_v28  ;;  %v2850_v28 = vld [vmem:[#allocation2 + $0x84] sm:$0xf]  ;;  %v3067_v35 = vld [vmem:[#allocation2 + $0x48] sm:$0xf] }
 0x179   : > { %1266 = vmatpush.bf16.msra.mxu2 %v2859_v30  ;;  %v2839_v51 = vor.u32 %v3067_v35, %v2836_v3  ;;  %v3070_v30 = vld [vmem:[#allocation2 + $0x70] sm:$0xf0] }
 0x17a   : > { %v3886_v4 = vpop.permute.xlu0 %1376  ;;  %v3068_v3 = vld [vmem:[#allocation2 + $0x50] sm:$0xf0] }
 0x17b   : > { %1094 = vmatmul.bf16.gmra.mxu1 %v3028_v5 }
 0x17c   : > { %1745 = vrot.lane.b32.xlu2 %v4790_v7, %s3145_s13  ;;  %1297 = vmatpush.bf16.msra.mxu3 %v2847_v63 }
 0x17e   : > { %1743 = vrot.lane.b32.xlu1 %v4792_v33, %s3145_s13  ;;  %v1381_v17 = vpop.permute.xlu2 %1380  ;;  %v2851_v33 = vor.u32 %v3072_v36, %v2850_v28  ;;  %v2843_v28 = vor.u32 %v3070_v30, %v2842_v16  ;;  %v2828_v36 = vld [vmem:[#allocation2 + $0x34] sm:$0xf0]  ;;  %v2826_v30 = vld [vmem:[#allocation2 + $0x24] sm:$0xf] }
 0x17f   : > { %v2831_v35 = vor.u32 %v3065_v50, %v2828_v36  ;;  %v3066_v50 = vld [vmem:[#allocation2 + $0x30] sm:$0xf0] }
 0x180   : > { %v3898_v58 = vpop.permute.xlu1 %1378  ;;  %1735 = vrot.lane.b32.xlu0 %v4786_v22, %s3145_s13  ;;  %1267 = vmatpush.bf16.msra.mxu2 %v2851_v33  ;;  %v2820_v22 = vld [vmem:[#allocation2 + $0x14] sm:$0xf0] }
 0x181   : > { %1065 = vmatmul.bf16.gmra.mxu0 %v3028_v5  ;;  %1298 = vmatpush.bf16.msra.mxu3 %v2839_v51  ;;  %v1406_v36 = vsel %vm1394_vm5, %v3898_v58, %v1381_v17  ;;  %v1404_v17 = vsel %vm1394_vm5, %v3882_v38, %v3841_v0  ;;  %v1402_v0 = vsel %vm1394_vm5, %v3870_v41, %v3813_v37 }
 0x182   : > { %v1393_v14 = vpop.permute.xlu0 %1392  ;;  %v1400_v37 = vsel %vm1394_vm5, %v3846_v45, %v3785_v40  ;;  %v3030_v40 = vld [vmem:[%s4691_s1 + $0xd8] sm:$0xff] }
 0x183   : > { %v1410_v7 = vsel %vm1394_vm5, %v3868_v11, %v1393_v14  ;;  %v3063_v14 = vld [vmem:[#allocation2 + $0x8] sm:$0xf] }
 0x184   : > { %1456 = vmatpush.bf16.msra.mxu1 %v1410_v7  ;;  %1739 = vrot.lane.b32.xlu2 %v4793_v49, %s3145_s13  ;;  %v2834_v7 = vld [vmem:[#allocation2 + $0x44] sm:$0xf]  ;;  %v2823_v49 = vor.u32 %v3063_v14, %v2820_v22  ;;  %v2827_v22 = vor.u32 %v3066_v50, %v2826_v30 }
 0x185   : > { %1268 = vmatpush.bf16.msra.mxu2 %v2843_v28  ;;  %1299 = vmatpush.bf16.msra.mxu3 %v2831_v35  ;;  %v2835_v51 = vor.u32 %v3068_v3, %v2834_v7 }
 0x186   : > { %1737 = vrot.lane.b32.xlu1 %v4787_v23, %s3145_s13  ;;  %v1523_v63 = vpop.permute.xlu2 %1522 }
 0x188   : > { %v1389_v5 = vpop.permute.xlu1 %1388  ;;  %1729 = vrot.lane.b32.xlu0 %v4783_v34, %s3145_s13 }
 0x189   : > { %v1409_v33 = vsel %vm1394_vm5, %v1389_v5, %v3868_v11  ;;  %1269 = vmatpush.bf16.msra.mxu2 %v2835_v51  ;;  %1300 = vmatpush.bf16.msra.mxu3 %v2823_v49  ;;  %v3059_v11 = vld [vmem:[%s4691_s1 + $0x80] sm:$0xff]  ;;  %v3064_v5 = vld [vmem:[#allocation2 + $0x10] sm:$0xf0] }
 0x18a   : > { %1427 = vmatpush.bf16.msra.mxu0 %v1409_v33  ;;  %v1387_v23 = vpop.permute.xlu0 %1386  ;;  %v2818_v49 = vld [vmem:[#allocation2 + $0x4] sm:$0xf]  ;;  %v1405_v33 = vsel %vm1394_vm5, %v3886_v4, %v3898_v58  ;;  %v1403_v4 = vsel %vm1394_vm5, %v3874_v6, %v3882_v38  ;;  %v1401_v6 = vsel %vm1394_vm5, %v3853_v46, %v3870_v41  ;;  %v3060_v38 = vld [vmem:[%s4691_s1 + $0x88] sm:$0xff]  ;;  %v1399_v46 = vsel %vm1394_vm5, %v3829_v31, %v3846_v45 }
 0x18b   : > { %v1408_v16 = vsel %vm1394_vm5, %v3880_v2, %v1387_v23  ;;  %v3029_v23 = vld [vmem:[%s4691_s1 + $0xd0] sm:$0xff]  ;;  %v2819_v3 = vor.u32 %v3064_v5, %v2818_v49 }
 0x18c   : > { %1457 = vmatpush.bf16.msra.mxu1 %v1408_v16  ;;  %1733 = vrot.lane.b32.xlu2 %v4784_v24, %s3145_s13 }
 0x18d   : > { %1301 = vmatmul.bf16.vlgmr.msra.gmra.mxu3 %v3059_v11  ;;  %1270 = vmatpush.bf16.msra.mxu2 %v2827_v22 }
 0x18e   : > { %1731 = vrot.lane.b32.xlu1 %v4785_v59, %s3145_s13  ;;  %v1529_v28 = vpop.permute.xlu2 %1528  ;;  %1099 = vmatmul.bf16.gmra.mxu1 %v3029_v23  ;;  %v4016_v31 = vpop.f32.mrf.mxu3 }
 0x190   : > { %v1383_v35 = vpop.permute.xlu1 %1382  ;;  %1723 = vrot.lane.b32.xlu0 %v4779_v43, %s3145_s13  ;;  %1458 = vmatpush.bf16.msra.mxu1 %v1406_v36 }
 0x191   : > { %v1407_v7 = vsel %vm1394_vm5, %v1383_v35, %v3880_v2  ;;  %1070 = vmatmul.bf16.gmra.mxu0 %v3029_v23  ;;  %1271 = vmatpush.bf16.msra.mxu2 %v2819_v3 }
 0x192   : > { %1428 = vmatpush.bf16.msra.mxu0 %v1407_v7  ;;  %v1519_v14 = vpop.permute.xlu0 %1518 }
 0x194   : > { %1459 = vmatpush.bf16.msra.mxu1 %v1404_v17  ;;  %1727 = vrot.lane.b32.xlu2 %v4781_v48, %s3145_s13 }
 0x195   : > { %1272 = vmatmul.bf16.vlgmr.msra.gmra.mxu2 %v3059_v11  ;;  %v1398_v11 = vsel %vm1394_vm5, %v3818_v57, %v3773_v25 }
 0x196   : > { %1725 = vrot.lane.b32.xlu1 %v4782_v21, %s3145_s13  ;;  %1429 = vmatpush.bf16.msra.mxu0 %v1405_v33  ;;  %v3940_v2 = vpop.permute.xlu2 %1534  ;;  %v4028_v36 = vpop.f32.mrf.mxu3 }
 0x198   : > { %v1521_v51 = vpop.permute.xlu1 %1520  ;;  %1717 = vrot.lane.b32.xlu0 %v3444_v54, %s3145_s13  ;;  %1460 = vmatpush.bf16.msra.mxu1 %v1402_v0 }
 0x199   : > { %v3951_v58 = vsel %vm1566_vm6, %v1521_v51, %v1523_v63  ;;  %v3954_v16 = vsel %vm1566_vm6, %v1519_v14, %v1521_v51 }
 0x19a   : > { %1430 = vmatpush.bf16.msra.mxu0 %v1403_v4  ;;  %v1525_v30 = vpop.permute.xlu0 %1524 }
 0x19c   : > { %1461 = vmatpush.bf16.msra.mxu1 %v1400_v37  ;;  %1721 = vrot.lane.b32.xlu2 %v3446_v55, %s3145_s13 }
 0x19d   : > { %1306 = vmatmul.bf16.gmra.mxu3 %v3060_v38 }
 0x19e   : > { %1719 = vrot.lane.b32.xlu1 %v4777_v1, %s3145_s13  ;;  %1431 = vmatpush.bf16.msra.mxu0 %v1401_v6  ;;  %v3969_v63 = vpop.permute.xlu2 %1540 }
 0x19f   : > { %1104 = vmatmul.bf16.gmra.mxu1 %v3030_v40  ;;  %v4044_v3 = vpop.f32.mrf.mxu3 }
 0x1a0   : > { %v1527_v50 = vpop.permute.xlu1 %1526  ;;  %1922 = vrot.lane.b32.xlu0 %v3334_v27, %s3146_s10  ;;  %1462 = vmatpush.bf16.msra.mxu1 %v1398_v11 }
 0x1a1   : > { %v3983_v41 = vsel %vm1566_vm6, %v1527_v50, %v1529_v28  ;;  %v3986_v22 = vsel %vm1566_vm6, %v1525_v30, %v1527_v50  ;;  %1075 = vmatmul.bf16.gmra.mxu0 %v3030_v40  ;;  %v4795_v50 = vld [vmem:[#allocation14_spill] sm:$0xff] }
 0x1a2   : > { %1432 = vmatpush.bf16.msra.mxu0 %v1399_v46  ;;  %v1531_v23 = vpop.permute.xlu0 %1530 }
 0x1a4   : > { %1463 = vmatpush.bf16.msra.mxu1 %v3799_v47  ;;  %1715 = vrot.lane.b32.xlu2 %v3430_v44, %s3145_s13  ;;  %s3147_s13 = smov 111  }
 0x1a5   : > { %1277 = vmatmul.bf16.gmra.mxu2 %v3060_v38  ;;  %v3055_v38 = vld [vmem:[%s4691_s1 + $0x20] sm:$0xff] }
 0x1a6   : > { %1924 = vrot.lane.b32.xlu1 %v3342_v32, %s3146_s10  ;;  %1433 = vmatpush.bf16.msra.mxu0 %v3827_v29  ;;  %v1561_v25 = vpop.permute.xlu2 %1560  ;;  %v3061_v32 = vld [vmem:[%s4691_s1 + $0x90] sm:$0xff] }
 0x1a7   : > { %v4055_v0 = vpop.f32.mrf.mxu3 }
 0x1a8   : > { %v3994_v27 = vpop.permute.xlu1 %1532  ;;  %1916 = vrot.lane.b32.xlu0 %v3322_v19, %s3146_s10  ;;  %4794 = vst [vmem:[#allocation15_spill] sm:$0xff] %v4055_v0 }
 0x1a9   : > { %v4000_v57 = vsel %vm1566_vm6, %v1531_v23, %v3994_v27 }
 0x1aa   : > { %1434 = vmatpush.bf16.msra.mxu0 %v3796_v60  ;;  %v4003_v47 = vpop.permute.xlu0 %1536 }
 0x1ac   : > { %1920 = vrot.lane.b32.xlu2 %v3324_v20, %s3146_s10 }
 0x1ad   : > { %1311 = vmatmul.bf16.gmra.mxu3 %v3061_v32 }
 0x1ae   : > { %1918 = vrot.lane.b32.xlu1 %v3332_v26, %s3146_s10  ;;  %v1555_v19 = vpop.permute.xlu2 %1554 }
 0x1af   : > { %1464 = vmatmul.bf16.vlgmr.msra.gmra.mxu1 %v3055_v38 }
 0x1b0   : > { %v4012_v29 = vpop.permute.xlu1 %1538  ;;  %1910 = vrot.lane.b32.xlu0 %v3310_v9, %s3146_s10  ;;  %v4025_v9 = vpop.f32.mrf.mxu2 }
 0x1b1   : > { %1435 = vmatmul.bf16.vlgmr.msra.gmra.mxu0 %v3055_v38 }
 0x1b2   : > { %v1563_v60 = vpop.permute.xlu0 %1562 }
 0x1b3   : > { %v1581_v45 = vsel %vm1566_vm6, %v1561_v25, %v1563_v60 }
 0x1b4   : > { %1599 = vmatpush.bf16.msrb.mxu2 %v1581_v45  ;;  %1914 = vrot.lane.b32.xlu2 %v3312_v10, %s3146_s10 }
 0x1b5   : > { %1282 = vmatmul.bf16.gmra.mxu2 %v3061_v32  ;;  %v782_v40 = vpop.f32.mrf.mxu3  ;;  %v4796_v32 = vld [vmem:[#allocation31_spill] sm:$0xff] }
 0x1b6   : > { %1912 = vrot.lane.b32.xlu1 %v3320_v18, %s3146_s10  ;;  %v1760_v20 = vpop.permute.xlu2 %1759  ;;  %v3062_v18 = vld [vmem:[%s4691_s1 + $0x98] sm:$0xff] }
 0x1b8   : > { %v1565_v26 = vpop.permute.xlu1 %1564  ;;  %2096 = vrot.lane.b32.xlu0 %v3546_v56, %s3147_s13  ;;  %v4041_v7 = vpop.f32.mrf.mxu2 }
 0x1b9   : > { %v1582_v28 = vsel %vm1566_vm6, %v1563_v60, %v1565_v26 }
 0x1ba   : > { %1628 = vmatpush.bf16.msrb.mxu3 %v1582_v28  ;;  %v1557_v35 = vpop.permute.xlu0 %1556  ;;  %v4797_v28 = vld [vmem:[#allocation29_spill] sm:$0xff] }
 0x1bb   : > { %v1579_v10 = vsel %vm1566_vm6, %v1555_v19, %v1557_v35 }
 0x1bc   : > { %1600 = vmatpush.bf16.msrb.mxu2 %v1579_v10  ;;  %2094 = vrot.lane.b32.xlu2 %v3557_v39, %s3147_s13  ;;  %v1574_v10 = vsel %vm1566_vm6, %v4012_v29, %v3969_v63  ;;  %v1572_v63 = vsel %vm1566_vm6, %v3994_v27, %v3940_v2  ;;  %v1573_v2 = vsel %vm1566_vm6, %v4003_v47, %v4012_v29  ;;  %v4801_v27 = vld [vmem:[#allocation13_spill] sm:$0xff]  ;;  %v3079_v47 = vld [vmem:[%s4691_s1 + $0xe0] sm:$0xff] }
 0x1bd   : > { %1316 = vmatmul.bf16.gmra.mxu3 %v3062_v18 }
 0x1be   : > { %1908 = vrot.lane.b32.xlu1 %v3300_v62, %s3146_s10  ;;  %v1758_v56 = vpop.permute.xlu2 %1757 }
 0x1bf   : > { %v1778_v49 = vsel %vm1763_vm7, %v1758_v56, %v1760_v20 }
 0x1c0   : > { %v1559_v5 = vpop.permute.xlu1 %1558  ;;  %1904 = vrot.lane.b32.xlu0 %v3298_v61, %s3146_s10  ;;  %1796 = vmatpush.bf16.msrb.mxu0 %v1778_v49  ;;  %v4052_v61 = vpop.f32.mrf.mxu2 }
 0x1c1   : > { %v1580_v39 = vsel %vm1566_vm6, %v1557_v35, %v1559_v5 }
 0x1c2   : > { %1629 = vmatpush.bf16.msrb.mxu3 %v1580_v39  ;;  %v1551_v14 = vpop.permute.xlu0 %1550  ;;  %v4799_v39 = vld [vmem:[#allocation11_spill] sm:$0xff] }
 0x1c4   : > { %2092 = vrot.lane.b32.xlu2 %v3567_v13, %s3147_s13 }
 0x1c5   : > { %1287 = vmatmul.bf16.gmra.mxu2 %v3062_v18  ;;  %v4798_v18 = vld [vmem:[#allocation12_spill] sm:$0xff] }
 0x1c6   : > { %1906 = vrot.lane.b32.xlu1 %v3308_v8, %s3146_s10  ;;  %v1754_v62 = vpop.permute.xlu2 %1753  ;;  %v619_v8 = vpop.f32.mrf.mxu1 }
 0x1c7   : > { %v4071_v11 = vadd.f32 %v782_v40, %v619_v8 }
 0x1c8   : > { %v1553_v17 = vpop.permute.xlu1 %1552  ;;  %2090 = vrot.lane.b32.xlu0 %v3583_v15, %s3147_s13  ;;  %v590_v15 = vpop.f32.mrf.mxu0 }
 0x1c9   : > { %v1578_v33 = vsel %vm1566_vm6, %v1551_v14, %v1553_v17  ;;  %v4065_v6 = vpop.f32.mrf.mxu2 }
 0x1ca   : > { %1630 = vmatpush.bf16.msrb.mxu3 %v1578_v33  ;;  %v1762_v51 = vpop.permute.xlu0 %1761 }
 0x1cb   : > { %v1779_v4 = vsel %vm1763_vm7, %v1760_v20, %v1762_v51  ;;  %v4084_v20 = vpop.f32.mrf.mxu3 }
 0x1cc   : > { %1825 = vmatpush.bf16.msrb.mxu1 %v1779_v4  ;;  %2088 = vrot.lane.b32.xlu2 %v3542_v12, %s3147_s13 }
 0x1ce   : > { %1902 = vrot.lane.b32.xlu1 %v3288_v53, %s3146_s10  ;;  %v1752_v13 = vpop.permute.xlu2 %1751 }
 0x1cf   : > { %v1776_v30 = vsel %vm1763_vm7, %v1752_v13, %v1754_v62  ;;  %v4800_v13 = vld [vmem:[#allocation26_spill] sm:$0xff] }
 0x1d0   : > { %v1549_v37 = vpop.permute.xlu1 %1548  ;;  %1898 = vrot.lane.b32.xlu0 %v3286_v52, %s3146_s10  ;;  %1797 = vmatpush.bf16.msrb.mxu0 %v1776_v30  ;;  %v4075_v52 = vpop.f32.mrf.mxu1 }
 0x1d1   : > { %v1577_v12 = vsel %vm1566_vm6, %v1549_v37, %v1551_v14  ;;  %v4079_v23 = vpop.f32.mrf.mxu0  ;;  %v753_v19 = vpop.f32.mrf.mxu2 }
 0x1d2   : > { %1601 = vmatpush.bf16.msrb.mxu2 %v1577_v12  ;;  %v1545_v53 = vpop.permute.xlu0 %1544  ;;  %v754_v45 = vadd.f32 %v753_v19, %v590_v15  ;;  %v4802_v12 = vld [vmem:[#allocation28_spill] sm:$0xff]  ;;  %v4804_v19 = vld [vmem:[#allocation6_spill] sm:$0xff] }
 0x1d3   : > { %v787_v33 = vpop.f32.mrf.mxu3 }
 0x1d4   : > { %2086 = vrot.lane.b32.xlu2 %v4789_v42, %s3147_s13 }
 0x1d6   : > { %1900 = vrot.lane.b32.xlu1 %v4795_v50, %s3146_s10  ;;  %v1746_v46 = vpop.permute.xlu2 %1745 }
 0x1d8   : > { %v1547_v25 = vpop.permute.xlu1 %1546  ;;  %2084 = vrot.lane.b32.xlu0 %v4796_v32, %s3147_s13  ;;  %v624_v35 = vpop.f32.mrf.mxu1 }
 0x1d9   : > { %v1576_v60 = vsel %vm1566_vm6, %v1545_v53, %v1547_v25  ;;  %v595_v49 = vpop.f32.mrf.mxu0  ;;  %v4096_v14 = vpop.f32.mrf.mxu2  ;;  %v4105_v4 = vadd.f32 %v787_v33, %v624_v35  ;;  %v4803_v25 = vld [vmem:[#allocation25_spill] sm:$0xff] }
 0x1da   : > { %1631 = vmatpush.bf16.msrb.mxu3 %v1576_v60  ;;  %v1756_v42 = vpop.permute.xlu0 %1755 }
 0x1db   : > { %v1777_v26 = vsel %vm1763_vm7, %v1754_v62, %v1756_v42  ;;  %v3056_v62 = vld [vmem:[%s4691_s1 + $0x28] sm:$0xff] }
 0x1dc   : > { %1826 = vmatpush.bf16.msrb.mxu1 %v1777_v26  ;;  %2082 = vrot.lane.b32.xlu2 %v4797_v28, %s3147_s13 }
 0x1dd   : > { %1469 = vmatmul.bf16.gmra.mxu1 %v3056_v62  ;;  %1440 = vmatmul.bf16.gmra.mxu0 %v3056_v62 }
 0x1de   : > { %1896 = vrot.lane.b32.xlu1 %v4798_v18, %s3146_s10  ;;  %1632 = vmatpush.bf16.msrb.mxu3 %v1574_v10  ;;  %v1740_v56 = vpop.permute.xlu2 %1739  ;;  %v3057_v10 = vld [vmem:[%s4691_s1 + $0x30] sm:$0xff] }
 0x1e0   : > { %v1543_v5 = vpop.permute.xlu1 %1542  ;;  %1892 = vrot.lane.b32.xlu0 %v4799_v39, %s3146_s10  ;;  %v4110_v15 = vpop.f32.mrf.mxu1  ;;  %v4807_v39 = vld [vmem:[#allocation10_spill] sm:$0xff] }
 0x1e1   : > { %v1575_v17 = vsel %vm1566_vm6, %v1543_v5, %v1545_v53  ;;  %v4117_v37 = vpop.f32.mrf.mxu0  ;;  %v758_v40 = vpop.f32.mrf.mxu2 }
 0x1e2   : > { %1602 = vmatpush.bf16.msrb.mxu2 %v1575_v17  ;;  %1633 = vmatpush.bf16.msrb.mxu3 %v1572_v63  ;;  %v1748_v51 = vpop.permute.xlu0 %1747  ;;  %v759_v50 = vadd.f32 %v758_v40, %v595_v49 }
 0x1e3   : > { %v1774_v8 = vsel %vm1763_vm7, %v1746_v46, %v1748_v51  ;;  %v4123_v46 = vpop.f32.mrf.mxu3 }
 0x1e4   : > { %1798 = vmatpush.bf16.msrb.mxu0 %v1774_v8  ;;  %2080 = vrot.lane.b32.xlu2 %v4800_v13, %s3147_s13  ;;  %v3080_v13 = vld [vmem:[%s4691_s1 + $0xe8] sm:$0xff] }
 0x1e6   : > { %1894 = vrot.lane.b32.xlu1 %v4801_v27, %s3146_s10  ;;  %1603 = vmatpush.bf16.msrb.mxu2 %v1573_v2  ;;  %v1734_v30 = vpop.permute.xlu2 %1733 }
 0x1e7   : > { %1634 = vmatpush.bf16.msrb.mxu3 %v3983_v41 }
 0x1e8   : > { %v1750_v38 = vpop.permute.xlu1 %1749  ;;  %2078 = vrot.lane.b32.xlu0 %v4802_v12, %s3147_s13  ;;  %v1090_v32 = vpop.f32.mrf.mxu1 }
 0x1e9   : > { %v1775_v53 = vsel %vm1763_vm7, %v1748_v51, %v1750_v38  ;;  %v4136_v60 = vadd.f32 %v1090_v32, %v4071_v11  ;;  %v4141_v28 = vpop.f32.mrf.mxu2  ;;  %v4810_v38 = vld [vmem:[#allocation4_spill] sm:$0xff]  ;;  %v3058_v32 = vld [vmem:[%s4691_s1 + $0x38] sm:$0xff] }
 0x1ea   : > { %1604 = vmatpush.bf16.msrb.mxu2 %v4000_v57  ;;  %1827 = vmatpush.bf16.msrb.mxu1 %v1775_v53  ;;  %v1742_v29 = vpop.permute.xlu0 %1741 }
 0x1eb   : > { %1635 = vmatpush.bf16.msrb.mxu3 %v3951_v58  ;;  %v1772_v41 = vsel %vm1763_vm7, %v1740_v56, %v1742_v29  ;;  %v4805_v58 = vld [vmem:[#allocation7_spill] sm:$0xff]  ;;  %v792_v56 = vpop.f32.mrf.mxu3 }
 0x1ec   : > { %1799 = vmatpush.bf16.msrb.mxu0 %v1772_v41  ;;  %2076 = vrot.lane.b32.xlu2 %v4803_v25, %s3147_s13  ;;  %v4150_v49 = vadd.f32 %v792_v56, %v4016_v31 }
 0x1ed   : > { %1474 = vmatmul.bf16.gmra.mxu1 %v3057_v10  ;;  %1445 = vmatmul.bf16.gmra.mxu0 %v3057_v10 }
 0x1ee   : > { %1636 = vmatmul.bf16.vlgmr.msrb.gmra.mxu3 %v3079_v47  ;;  %1890 = vrot.lane.b32.xlu1 %v4804_v19, %s3146_s10  ;;  %v1728_v57 = vpop.permute.xlu2 %1727  ;;  %v1061_v42 = vpop.f32.mrf.mxu0 }
 0x1ef   : > { %1605 = vmatpush.bf16.msrb.mxu2 %v3986_v22  ;;  %v4143_v35 = vadd.f32 %v1061_v42, %v754_v45  ;;  %v4806_v45 = vld [vmem:[#allocation23_spill] sm:$0xff] }
 0x1f0   : > { %v1744_v26 = vpop.permute.xlu1 %1743  ;;  %1886 = vrot.lane.b32.xlu0 %v4805_v58, %s3146_s10  ;;  %v4156_v5 = vpop.f32.mrf.mxu1 }
 0x1f1   : > { %v1773_v18 = vsel %vm1763_vm7, %v1742_v29, %v1744_v26  ;;  %v763_v63 = vpop.f32.mrf.mxu2  ;;  %v4811_v29 = vld [vmem:[#allocation9_spill] sm:$0xff] }
 0x1f2   : > { %1828 = vmatpush.bf16.msrb.mxu1 %v1773_v18  ;;  %v1736_v11 = vpop.permute.xlu0 %1735  ;;  %v764_v51 = vadd.f32 %v763_v63, %v4025_v9 }
 0x1f3   : > { %1606 = vmatpush.bf16.msrb.mxu2 %v3954_v16  ;;  %v1770_v22 = vsel %vm1763_vm7, %v1734_v30, %v1736_v11  ;;  %v4808_v16 = vld [vmem:[#allocation24_spill] sm:$0xff]  ;;  %v4166_v8 = vpop.f32.mrf.mxu3  ;;  %v4809_v30 = vld [vmem:[#allocation22_spill] sm:$0xff] }
 0x1f4   : > { %1800 = vmatpush.bf16.msrb.mxu0 %v1770_v22  ;;  %2074 = vrot.lane.b32.xlu2 %v4806_v45, %s3147_s13 }
 0x1f6   : > { %1607 = vmatmul.bf16.vlgmr.msrb.gmra.mxu2 %v3079_v47  ;;  %1888 = vrot.lane.b32.xlu1 %v4807_v39, %s3146_s10  ;;  %v1722_v62 = vpop.permute.xlu2 %1721  ;;  %v4160_v17 = vpop.f32.mrf.mxu0 }
 0x1f8   : > { %v1738_v31 = vpop.permute.xlu1 %1737  ;;  %2072 = vrot.lane.b32.xlu0 %v4808_v16, %s3147_s13  ;;  %v1095_v9 = vpop.f32.mrf.mxu1 }
 0x1f9   : > { %v1771_v33 = vsel %vm1763_vm7, %v1736_v11, %v1738_v31  ;;  %v4177_v40 = vadd.f32 %v1095_v9, %v4105_v4  ;;  %v4181_v41 = vpop.f32.mrf.mxu2 }
 0x1fa   : > { %1829 = vmatpush.bf16.msrb.mxu1 %v1771_v33  ;;  %v1730_v2 = vpop.permute.xlu0 %1729 }
 0x1fb   : > { %v1768_v27 = vsel %vm1763_vm7, %v1728_v57, %v1730_v2  ;;  %v797_v57 = vpop.f32.mrf.mxu3 }
 0x1fc   : > { %1801 = vmatpush.bf16.msrb.mxu0 %v1768_v27  ;;  %2070 = vrot.lane.b32.xlu2 %v4809_v30, %s3147_s13  ;;  %v798_v4 = vadd.f32 %v797_v57, %v4044_v3 }
 0x1fd   : > { %1479 = vmatmul.bf16.gmra.mxu1 %v3058_v32  ;;  %1450 = vmatmul.bf16.gmra.mxu0 %v3058_v32 }
 0x1fe   : > { %1641 = vmatmul.bf16.gmra.mxu3 %v3080_v13  ;;  %1884 = vrot.lane.b32.xlu1 %v4810_v38, %s3146_s10  ;;  %v1716_v12 = vpop.permute.xlu2 %1715  ;;  %v1066_v53 = vpop.f32.mrf.mxu0 }
 0x1ff   : > { %v4183_v25 = vadd.f32 %v1066_v53, %v759_v50  ;;  %v4812_v50 = vld [vmem:[#allocation8_spill] sm:$0xff] }
 0x200   : > { %v1732_v47 = vpop.permute.xlu1 %1731  ;;  %1880 = vrot.lane.b32.xlu0 %v4811_v29, %s3146_s10  ;;  %v4195_v10 = vpop.f32.mrf.mxu1 }
 0x201   : > { %v1769_v19 = vsel %vm1763_vm7, %v1730_v2, %v1732_v47  ;;  %v768_v3 = vpop.f32.mrf.mxu2 }
 0x202   : > { %1830 = vmatpush.bf16.msrb.mxu1 %v1769_v19  ;;  %v1724_v42 = vpop.permute.xlu0 %1723  ;;  %v769_v22 = vadd.f32 %v768_v3, %v4052_v61 }
 0x203   : > { %v1766_v26 = vsel %vm1763_vm7, %v1722_v62, %v1724_v42 }
 0x204   : > { %1802 = vmatpush.bf16.msrb.mxu0 %v1766_v26  ;;  %2068 = vrot.lane.b32.xlu2 %v4784_v24, %s3147_s13  ;;  %v3081_v24 = vld [vmem:[%s4691_s1 + $0xf0] sm:$0xff] }
 0x206   : > { %1612 = vmatmul.bf16.gmra.mxu2 %v3080_v13  ;;  %1882 = vrot.lane.b32.xlu1 %v4812_v50, %s3146_s10  ;;  %v1921_v58 = vpop.permute.xlu2 %1920  ;;  %v4197_v18 = vpop.f32.mrf.mxu0 }
 0x208   : > { %v1726_v56 = vpop.permute.xlu1 %1725  ;;  %2066 = vrot.lane.b32.xlu0 %v4785_v59, %s3147_s13  ;;  %v4813_v59 = vld [vmem:[#allocation5_spill] sm:$0xff] }
 0x209   : > { %v1767_v11 = vsel %vm1763_vm7, %v1724_v42, %v1726_v56  ;;  %v4242_v53 = vpop.f32.mrf.mxu2 }
 0x20a   : > { %1831 = vmatpush.bf16.msrb.mxu1 %v1767_v11  ;;  %v1718_v45 = vpop.permute.xlu0 %1717  ;;  %4815 = vst [vmem:[#allocation16_spill] sm:$0xff] %v4242_v53 }
 0x20b   : > { %v1764_v39 = vsel %vm1763_vm7, %v1716_v12, %v1718_v45  ;;  %v1100_v31 = vpop.f32.mrf.mxu1 }
 0x20c   : > { %1803 = vmatpush.bf16.msrb.mxu0 %v1764_v39  ;;  %2064 = vrot.lane.b32.xlu2 %v4783_v34, %s3147_s13  ;;  %v4214_v61 = vadd.f32 %v1100_v31, %v4150_v49  ;;  %v4224_v49 = vpop.f32.mrf.mxu3 }
 0x20d   : > { %4814 = vst [vmem:[#allocation32_spill] sm:$0xff] %v4224_v49 }
 0x20e   : > { %1646 = vmatmul.bf16.gmra.mxu3 %v3081_v24  ;;  %1878 = vrot.lane.b32.xlu1 %v4813_v59, %s3146_s10  ;;  %v1915_v62 = vpop.permute.xlu2 %1914  ;;  %v1071_v33 = vpop.f32.mrf.mxu0 }
 0x20f   : > { %v4217_v34 = vadd.f32 %v1071_v33, %v764_v51 }
 0x210   : > { %v1720_v16 = vpop.permute.xlu1 %1719  ;;  %2058 = vrot.lane.b32.xlu0 %v4779_v43, %s3147_s13 }
 0x211   : > { %v1765_v63 = vsel %vm1763_vm7, %v1718_v45, %v1720_v16 }
 0x212   : > { %1832 = vmatpush.bf16.msrb.mxu1 %v1765_v63  ;;  %v1923_v13 = vpop.permute.xlu0 %1922 }
 0x213   : > { %v1941_v2 = vsel %vm1926_vm8, %v1921_v58, %v1923_v13  ;;  %v4226_v27 = vpop.f32.mrf.mxu1 }
 0x214   : > { %1959 = vmatpush.bf16.msra.mxu2 %v1941_v2  ;;  %2062 = vrot.lane.b32.xlu2 %v4781_v48, %s3147_s13  ;;  %v3082_v48 = vld [vmem:[%s4691_s1 + $0xf8] sm:$0xff]  ;;  %v4247_v57 = vpop.f32.mrf.mxu3 }
 0x216   : > { %1617 = vmatmul.bf16.gmra.mxu2 %v3081_v24  ;;  %2060 = vrot.lane.b32.xlu1 %v4782_v21, %s3147_s13  ;;  %v2095_v43 = vpop.permute.xlu2 %2094  ;;  %v4231_v38 = vpop.f32.mrf.mxu0 }
 0x218   : > { %v1925_v30 = vpop.permute.xlu1 %1924  ;;  %2052 = vrot.lane.b32.xlu0 %v3444_v54, %s3147_s13  ;;  %v4254_v56 = vpop.f32.mrf.mxu2 }
 0x219   : > { %v1942_v51 = vsel %vm1926_vm8, %v1923_v13, %v1925_v30  ;;  %v3088_v30 = vld [vmem:[%s4691_s1 + $0xa8] sm:$0xff] }
 0x21a   : > { %1988 = vmatpush.bf16.msra.mxu3 %v1942_v51  ;;  %v1917_v12 = vpop.permute.xlu0 %1916 }
 0x21b   : > { %v1939_v21 = vsel %vm1926_vm8, %v1915_v62, %v1917_v12 }
 0x21c   : > { %1960 = vmatpush.bf16.msra.mxu2 %v1939_v21  ;;  %2056 = vrot.lane.b32.xlu2 %v3446_v55, %s3147_s13  ;;  %v1105_v47 = vpop.f32.mrf.mxu1  ;;  %v4257_v11 = vpop.f32.mrf.mxu3 }
 0x21d   : > { %v4244_v32 = vadd.f32 %v1105_v47, %v798_v4 }
 0x21e   : > { %1651 = vmatmul.bf16.gmra.mxu3 %v3082_v48  ;;  %2054 = vrot.lane.b32.xlu1 %v4777_v1, %s3147_s13  ;;  %v2093_v54 = vpop.permute.xlu2 %2092  ;;  %v1076_v42 = vpop.f32.mrf.mxu0 }
 0x21f   : > { %v2113_v9 = vsel %vm2098_vm9, %v2093_v54, %v2095_v43  ;;  %v4249_v26 = vadd.f32 %v1076_v42, %v769_v22  ;;  %v3087_v22 = vld [vmem:[%s4691_s1 + $0xa0] sm:$0xff] }
 0x220   : > { %v1919_v29 = vpop.permute.xlu1 %1918  ;;  %2131 = vmatpush.bf16.msra.mxu0 %v2113_v9  ;;  %1833 = vmatmul.bf16.vlgmr.msrb.gmra.mxu1 %v3087_v22  ;;  %v1275_v62 = vpop.f32.mrf.mxu2 }
 0x221   : > { %v1940_v19 = vsel %vm1926_vm8, %v1917_v12, %v1919_v29  ;;  %1804 = vmatmul.bf16.vlgmr.msrb.gmra.mxu0 %v3087_v22 }
 0x222   : > { %1989 = vmatpush.bf16.msra.mxu3 %v1940_v19  ;;  %v1911_v55 = vpop.permute.xlu0 %1910 }
 0x224   : > { %2050 = vrot.lane.b32.xlu2 %v3430_v44, %s3147_s13  ;;  %v4264_v31 = vpop.f32.mrf.mxu3  ;;  %v4277_v29 = vpop.f32.mrf.mxu1 }
 0x225   : > { %4816 = vst [vmem:[#allocation27_spill] sm:$0xff] %v4277_v29  ;;  %v3083_v29 = vld [vmem:[%s4691_s1 + $0x40] sm:$0xff] }
 0x226   : > { %1622 = vmatmul.bf16.gmra.mxu2 %v3082_v48  ;;  %v2089_v1 = vpop.permute.xlu2 %2088 }
 0x228   : > { %v1913_v50 = vpop.permute.xlu1 %1912 }
 0x229   : > { %v1938_v58 = vsel %vm1926_vm8, %v1911_v55, %v1913_v50 }
 0x22a   : > { %1990 = vmatpush.bf16.msra.mxu3 %v1938_v58  ;;  %v2097_v4 = vpop.permute.xlu0 %2096 }
 0x22b   : > { %v2114_v3 = vsel %vm2098_vm9, %v2095_v43, %v2097_v4  ;;  %v4268_v43 = vpop.f32.mrf.mxu2  ;;  %v4285_v4 = vpop.f32.mrf.mxu0 }
 0x22c   : > { %2160 = vmatpush.bf16.msra.mxu1 %v2114_v3  ;;  %v4273_v48 = vpop.f32.mrf.mxu3  ;;  %4817 = vst [vmem:[#allocation17_spill] sm:$0xff] %v4285_v4  ;;  %v3089_v3 = vld [vmem:[%s4691_s1 + $0xb0] sm:$0xff] }
 0x22e   : > { %v2087_v24 = vpop.permute.xlu2 %2086 }
 0x22f   : > { %v2111_v44 = vsel %vm2098_vm9, %v2087_v24, %v2089_v1 }
 0x230   : > { %v1909_v45 = vpop.permute.xlu1 %1908  ;;  %2132 = vmatpush.bf16.msra.mxu0 %v2111_v44  ;;  %1838 = vmatmul.bf16.gmra.mxu1 %v3088_v30  ;;  %v1465_v44 = vpop.f32.mrf.mxu1 }
 0x231   : > { %v1937_v39 = vsel %vm1926_vm8, %v1909_v45, %v1911_v55  ;;  %1809 = vmatmul.bf16.gmra.mxu0 %v3088_v30 }
 0x232   : > { %1961 = vmatpush.bf16.msra.mxu2 %v1937_v39  ;;  %v1905_v59 = vpop.permute.xlu0 %1904  ;;  %v1466_v39 = vadd.f32 %v1465_v44, %v4247_v57 }
 0x233   : > { %v4279_v19 = vpop.f32.mrf.mxu2 }
 0x236   : > { %v2083_v16 = vpop.permute.xlu2 %2082 }
 0x238   : > { %v1907_v63 = vpop.permute.xlu1 %1906 }
 0x239   : > { %v1936_v33 = vsel %vm1926_vm8, %v1905_v59, %v1907_v63 }
 0x23a   : > { %1991 = vmatpush.bf16.msra.mxu3 %v1936_v33  ;;  %v2091_v13 = vpop.permute.xlu0 %2090 }
 0x23b   : > { %v2112_v2 = vsel %vm2098_vm9, %v2089_v1, %v2091_v13  ;;  %v4282_v1 = vpop.f32.mrf.mxu3  ;;  %v1436_v13 = vpop.f32.mrf.mxu0 }
 0x23c   : > { %2161 = vmatpush.bf16.msra.mxu1 %v2112_v2  ;;  %v4298_v2 = vadd.f32 %v1436_v13, %v4254_v56  ;;  %v3090_v56 = vld [vmem:[%s4691_s1 + $0xb8] sm:$0xff] }
 0x23e   : > { %v2081_v51 = vpop.permute.xlu2 %2080 }
 0x23f   : > { %v2109_v12 = vsel %vm2098_vm9, %v2081_v51, %v2083_v16  ;;  %v1467_v51 = vpop.f32.mrf.mxu1 }
 0x240   : > { %v1903_v21 = vpop.permute.xlu1 %1902  ;;  %2133 = vmatpush.bf16.msra.mxu0 %v2109_v12  ;;  %1843 = vmatmul.bf16.gmra.mxu1 %v3089_v3 }
 0x241   : > { %v1935_v54 = vsel %vm1926_vm8, %v1903_v21, %v1905_v59  ;;  %1814 = vmatmul.bf16.gmra.mxu0 %v3089_v3  ;;  %v4301_v21 = vadd.f32 %v1467_v51, %v4257_v11 }
 0x242   : > { %1962 = vmatpush.bf16.msra.mxu2 %v1935_v54  ;;  %v1899_v9 = vpop.permute.xlu0 %1898 }
 0x243   : > { %v4295_v33 = vpop.f32.mrf.mxu3 }
 0x246   : > { %v2077_v47 = vpop.permute.xlu2 %2076 }
 0x248   : > { %v1901_v42 = vpop.permute.xlu1 %1900 }
 0x249   : > { %v1934_v55 = vsel %vm1926_vm8, %v1899_v9, %v1901_v42 }
 0x24a   : > { %1992 = vmatpush.bf16.msra.mxu3 %v1934_v55  ;;  %v2085_v50 = vpop.permute.xlu0 %2084 }
 0x24b   : > { %v2110_v58 = vsel %vm2098_vm9, %v2083_v16, %v2085_v50  ;;  %v4293_v16 = vpop.f32.mrf.mxu2  ;;  %v4307_v55 = vpop.f32.mrf.mxu3 }
 0x24c   : > { %2162 = vmatpush.bf16.msra.mxu1 %v2110_v58  ;;  %v1438_v50 = vpop.f32.mrf.mxu0 }
 0x24d   : > { %v4312_v3 = vadd.f32 %v1438_v50, %v1275_v62 }
 0x24e   : > { %v2075_v22 = vpop.permute.xlu2 %2074 }
 0x24f   : > { %v2107_v24 = vsel %vm2098_vm9, %v2075_v22, %v2077_v47 }
 0x250   : > { %v1897_v45 = vpop.permute.xlu1 %1896  ;;  %2134 = vmatpush.bf16.msra.mxu0 %v2107_v24  ;;  %1848 = vmatmul.bf16.gmra.mxu1 %v3090_v56 }
 0x251   : > { %v1933_v59 = vsel %vm1926_vm8, %v1897_v45, %v1899_v9  ;;  %1819 = vmatmul.bf16.gmra.mxu0 %v3090_v56  ;;  %v4745_v45 = vlaneseq }
 0x252   : > { %1963 = vmatpush.bf16.msra.mxu2 %v1933_v59  ;;  %v1893_v63 = vpop.permute.xlu0 %1892 }
 0x253   : > { %v4304_v9 = vpop.f32.mrf.mxu2  ;;  %v4322_v62 = vand.u32 127, %v4745_v45 }
 0x255   : > { %v4334_v56 = vadd.s32 128, %v4322_v62 }
 0x256   : > { %v2071_v30 = vpop.permute.xlu2 %2070 }
 0x258   : > { %v1895_v12 = vpop.permute.xlu1 %1894 }
 0x259   : > { %v1932_v57 = vsel %vm1926_vm8, %v1893_v63, %v1895_v12 }
 0x25a   : > { %1993 = vmatpush.bf16.msra.mxu3 %v1932_v57  ;;  %v2079_v54 = vpop.permute.xlu0 %2078  ;;  %v1470_v24 = vpop.f32.mrf.mxu1 }
 0x25b   : > { %v2108_v42 = vsel %vm2098_vm9, %v2077_v47, %v2079_v54  ;;  %v4317_v44 = vadd.f32 %v1470_v24, %v4264_v31  ;;  %v4319_v13 = vpop.f32.mrf.mxu2  ;;  %v1441_v51 = vpop.f32.mrf.mxu0 }
 0x25c   : > { %2163 = vmatpush.bf16.msra.mxu1 %v2108_v42  ;;  %v4325_v57 = vadd.f32 %v1441_v51, %v4268_v43  ;;  %v4327_v54 = vpop.f32.mrf.mxu3  ;;  %v4746_v43 = vand.u32 15, %v4334_v56 }
 0x25e   : > { %v2069_v58 = vpop.permute.xlu2 %2068  ;;  %vm4350_vm10 = vcmp.ne.s32.totalorder %v4746_v43, 0 }
 0x25f   : > { %v2105_v11 = vsel %vm2098_vm9, %v2069_v58, %v2071_v30 }
 0x260   : > { %v1891_v22 = vpop.permute.xlu1 %1890  ;;  %2135 = vmatpush.bf16.msra.mxu0 %v2105_v11 }
 0x261   : > { %v1931_v47 = vsel %vm1926_vm8, %v1891_v22, %v1893_v63 }
 0x262   : > { %1964 = vmatpush.bf16.msra.mxu2 %v1931_v47  ;;  %v1887_v59 = vpop.permute.xlu0 %1886  ;;  %v1472_v63 = vpop.f32.mrf.mxu1 }
 0x263   : > { %v4331_v50 = vadd.f32 %v1472_v63, %v4273_v48  ;;  %v1443_v22 = vpop.f32.mrf.mxu0  ;;  %v4341_v51 = vpop.f32.mrf.mxu2 }
 0x264   : > { %v4339_v47 = vadd.f32 %v1443_v22, %v4279_v19  ;;  %v2278_v22 = vld [vmem:[%s4692_s2 + $0x8] sm:$0xff] }
 0x265   : > { %2292 = vperm.xlu1 %3129, %v2278_v22  }
 0x266   : > { %v2065_v12 = vpop.permute.xlu2 %2064 }
 0x268   : > { %v1889_v42 = vpop.permute.xlu1 %1888 }
 0x269   : > { %v1930_v31 = vsel %vm1926_vm8, %v1887_v59, %v1889_v42 }
 0x26a   : > { %1994 = vmatpush.bf16.msra.mxu3 %v1930_v31  ;;  %v2073_v58 = vpop.permute.xlu0 %2072  ;;  %v1475_v63 = vpop.f32.mrf.mxu1 }
 0x26b   : > { %v2106_v11 = vsel %vm2098_vm9, %v2071_v30, %v2073_v58  ;;  %v4346_v30 = vadd.f32 %v1475_v63, %v4282_v1 }
 0x26c   : > { %2164 = vmatpush.bf16.msra.mxu1 %v2106_v11 }
 0x26e   : > { %v2063_v24 = vpop.permute.xlu2 %2062 }
 0x26f   : > { %v2103_v48 = vsel %vm2098_vm9, %v2063_v24, %v2065_v12  ;;  %v1446_v24 = vpop.f32.mrf.mxu0 }
 0x270   : > { %v1885_v42 = vpop.permute.xlu1 %1884  ;;  %2136 = vmatpush.bf16.msra.mxu0 %v2103_v48  ;;  %v4747_v48 = vand.u32 15, %v4322_v62 }
 0x271   : > { %v1637_v45 = vpop.f32.mrf.mxu3  ;;  %v1929_v31 = vsel %vm1926_vm8, %v1885_v42, %v1887_v59  ;;  %v2210_v59 = vsel %vm4350_vm10, %v4136_v60, 0.0  ;;  %v4364_v42 = vadd.f32 %v1446_v24, %v4293_v16  ;;  %v2280_v24 = vld [vmem:[%s4692_s2 + $0x18] sm:$0xff] }
 0x272   : > { %v1658_v19 = vadd.f32 %v1637_v45, %v1466_v39  ;;  %1965 = vmatpush.bf16.msra.mxu2 %v1929_v31  ;;  %v1881_v11 = vpop.permute.xlu0 %1880  ;;  %v1477_v45 = vpop.f32.mrf.mxu1  ;;  %vm4375_vm11 = vcmp.ne.s32.totalorder %v4747_v48, 0  ;;  %2302 = vperm.xlu1 %3129, %v2280_v24   ;;  %v2277_v48 = vld [vmem:[%s4692_s2] sm:$0xff] }
 0x273   : > { %v4371_v60 = vadd.f32 %v1477_v45, %v4295_v33  ;;  %v2209_v33 = vsel %vm4375_vm11, %v4143_v35, 0.0  ;;  %2287 = vperm.xlu0 %3128, %v2277_v48  }
 0x274   : > { %v4360_v1 = vadd.f32 %v2210_v59, %v1658_v19 }
 0x278   : > { %v1883_v39 = vpop.permute.xlu1 %1882 }
 0x279   : > { %v1608_v63 = vpop.f32.mrf.mxu2  ;;  %v1639_v31 = vpop.f32.mrf.mxu3  ;;  %v1928_v43 = vsel %vm1926_vm8, %v1881_v11, %v1883_v39 }
 0x27a   : > { %v1657_v16 = vadd.f32 %v1608_v63, %v4298_v2  ;;  %v4381_v22 = vadd.f32 %v1639_v31, %v4301_v21  ;;  %1995 = vmatpush.bf16.msra.mxu3 %v1928_v43  ;;  %v2067_v59 = vpop.permute.xlu0 %2066  ;;  %v2057_v2 = vpop.permute.xlu2 %2056 }
 0x27b   : > { %v2104_v39 = vsel %vm2098_vm9, %v2065_v12, %v2067_v59  ;;  %v1448_v21 = vpop.f32.mrf.mxu0  ;;  %v1480_v31 = vpop.f32.mrf.mxu1 }
 0x27c   : > { %v4390_v45 = vadd.f32 %v2209_v33, %v1657_v16  ;;  %2165 = vmatpush.bf16.msra.mxu1 %v2104_v39  ;;  %v4393_v43 = vadd.f32 %v1448_v21, %v4304_v9  ;;  %v4400_v16 = vadd.f32 %v1480_v31, %v4307_v55  ;;  %v2358_v33 = vld [vmem:[%s4693_s3 + $0x8] sm:$0xff]  ;;  %v2214_v39 = vsel %vm4350_vm10, %v4177_v40, 0.0 }
 0x27d   : > { %1996 = vmatmul.bf16.vlgmr.msra.gmra.mxu3 %v3083_v29  ;;  %2372 = vperm.xlu1 %3129, %v2358_v33   ;;  %v2360_v33 = vld [vmem:[%s4693_s3 + $0x18] sm:$0xff] }
 0x280   : > { %v1879_v63 = vpop.permute.xlu1 %1878 }
 0x281   : > { %v1610_v49 = vpop.f32.mrf.mxu2  ;;  %v1642_v35 = vpop.f32.mrf.mxu3  ;;  %v1927_v12 = vsel %vm1926_vm8, %v1879_v63, %v1881_v11  ;;  %v2357_v63 = vld [vmem:[%s4693_s3] sm:$0xff] }
 0x282   : > { %v4403_v59 = vadd.f32 %v1610_v49, %v4312_v3  ;;  %v1662_v9 = vadd.f32 %v1642_v35, %v4317_v44  ;;  %1966 = vmatpush.bf16.msra.mxu2 %v1927_v12  ;;  %v2059_v24 = vpop.permute.xlu0 %2058  ;;  %v2051_v44 = vpop.permute.xlu2 %2050  ;;  %v3084_v35 = vld [vmem:[%s4691_s1 + $0x48] sm:$0xff]  ;;  %2367 = vperm.xlu0 %3128, %v2357_v63  }
 0x283   : > { %v2101_v11 = vsel %vm2098_vm9, %v2057_v2, %v2059_v24  ;;  %v1451_v49 = vpop.f32.mrf.mxu0  ;;  %v1482_v21 = vpop.f32.mrf.mxu1 }
 0x284   : > { %v4413_v55 = vadd.f32 %v2214_v39, %v1662_v9  ;;  %2137 = vmatpush.bf16.msra.mxu0 %v2101_v11  ;;  %v4416_v3 = vadd.f32 %v1451_v49, %v4319_v13  ;;  %v2279_v49 = vld [vmem:[%s4692_s2 + $0x10] sm:$0xff] }
 0x285   : > { %1967 = vmatmul.bf16.vlgmr.msra.gmra.mxu2 %v3083_v29  ;;  %v4426_v29 = vadd.f32 %v1482_v21, %v4327_v54  ;;  %v3091_v54 = vld [vmem:[%s4691_s1 + $0x100] sm:$0xff]  ;;  %2382 = vperm.xlu1 %3129, %v2360_v33  }
 0x286   : > { %2297 = vperm.xlu2 %3130, %v2279_v49  }
 0x288   : > { %v2061_v48 = vpop.permute.xlu1 %2060 }
 0x289   : > { %v1613_v31 = vpop.f32.mrf.mxu2  ;;  %v1644_v40 = vpop.f32.mrf.mxu3  ;;  %v2102_v2 = vsel %vm2098_vm9, %v2059_v24, %v2061_v48  ;;  %v2213_v24 = vsel %vm4375_vm11, %v4183_v25, 0.0 }
 0x28a   : > { %v1661_v13 = vadd.f32 %v1613_v31, %v4325_v57  ;;  %v4430_v12 = vadd.f32 %v1644_v40, %v4331_v50  ;;  %2166 = vmatpush.bf16.msra.mxu1 %v2102_v2  ;;  %v2053_v9 = vpop.permute.xlu0 %2052  ;;  %v2284_v40 = vld [vmem:[%s4692_s2 + $0x38] sm:$0xff]  ;;  %v2218_v2 = vsel %vm4350_vm10, %v4214_v61, 0.0 }
 0x28b   : > { %v2099_v39 = vsel %vm2098_vm9, %v2051_v44, %v2053_v9  ;;  %v1453_v50 = vpop.f32.mrf.mxu0  ;;  %v2282_v44 = vld [vmem:[%s4692_s2 + $0x28] sm:$0xff] }
 0x28c   : > { %v4442_v57 = vadd.f32 %v2213_v24, %v1661_v13  ;;  %2138 = vmatpush.bf16.msra.mxu0 %v2099_v39  ;;  %v1454_v11 = vadd.f32 %v1453_v50, %v4341_v51  ;;  %2312 = vperm.xlu0 %3128, %v2282_v44   ;;  %v3092_v50 = vld [vmem:[%s4691_s1 + $0x108] sm:$0xff] }
 0x28d   : > { %2001 = vmatmul.bf16.gmra.mxu3 %v3084_v35  ;;  %2322 = vperm.xlu1 %3129, %v2284_v40  }
 0x28f   : > { %2139 = vmatmul.bf16.vlgmr.msra.gmra.mxu0 %v3091_v54 }
 0x290   : > { %v2055_v25 = vpop.permute.xlu1 %2054 }
 0x291   : > { %v1615_v48 = vpop.f32.mrf.mxu2  ;;  %v1647_v21 = vpop.f32.mrf.mxu3  ;;  %v2100_v63 = vsel %vm2098_vm9, %v2053_v9, %v2055_v25  ;;  %v2364_v9 = vld [vmem:[%s4693_s3 + $0x38] sm:$0xff]  ;;  %v2359_v25 = vld [vmem:[%s4693_s3 + $0x10] sm:$0xff] }
 0x292   : > { %v4453_v31 = vadd.f32 %v1615_v48, %v4339_v47  ;;  %v1666_v51 = vadd.f32 %v1647_v21, %v4346_v30  ;;  %2167 = vmatpush.bf16.msra.mxu1 %v2100_v63  ;;  %v2281_v47 = vld [vmem:[%s4692_s2 + $0x20] sm:$0xff]  ;;  %v2222_v21 = vsel %vm4350_vm10, %v4244_v32, 0.0  ;;  %v2221_v32 = vsel %vm4375_vm11, %v4249_v26, 0.0  ;;  %v3094_v26 = vld [vmem:[%s4691_s1 + $0x118] sm:$0xff] }
 0x293   : > { %v2361_v30 = vld [vmem:[%s4693_s3 + $0x20] sm:$0xff]  ;;  %2307 = vperm.xlu2 %3130, %v2281_v47  }
 0x294   : > { %v4462_v13 = vadd.f32 %v2218_v2, %v1666_v51  ;;  %2387 = vperm.xlu0 %3128, %v2361_v30   ;;  %v2283_v51 = vld [vmem:[%s4692_s2 + $0x30] sm:$0xff] }
 0x295   : > { %1972 = vmatmul.bf16.gmra.mxu2 %v3084_v35  ;;  %2168 = vmatmul.bf16.vlgmr.msra.gmra.mxu1 %v3091_v54  ;;  %v3085_v35 = vld [vmem:[%s4691_s1 + $0x50] sm:$0xff]  ;;  %v2217_v54 = vsel %vm4375_vm11, %v4217_v34, 0.0 }
 0x296   : > { %2402 = vperm.xlu1 %3129, %v2364_v9   ;;  %v3093_v30 = vld [vmem:[%s4691_s1 + $0x110] sm:$0xff] }
 0x299   : > { %v1618_v33 = vpop.f32.mrf.mxu2  ;;  %v1649_v61 = vpop.f32.mrf.mxu3 }
 0x29a   : > { %v1665_v24 = vadd.f32 %v1618_v33, %v4364_v42  ;;  %v4478_v39 = vadd.f32 %v1649_v61, %v4371_v60  ;;  %v2363_v42 = vld [vmem:[%s4693_s3 + $0x30] sm:$0xff]  ;;  %v2362_v33 = vld [vmem:[%s4693_s3 + $0x28] sm:$0xff]  ;;  %v2447_v61 = vld [vmem:[#allocation3] sm:$0x1] }
 0x29b   : > { %2377 = vperm.xlu2 %3130, %v2359_v25  }
 0x29c   : > { %v4486_v49 = vadd.f32 %v2217_v54, %v1665_v24  ;;  %2397 = vperm.xlu0 %3128, %v2363_v42  }
 0x29d   : > { %2006 = vmatmul.bf16.gmra.mxu3 %v3085_v35  ;;  %v1834_v24 = vpop.f32.mrf.mxu1 }
 0x29f   : > { %2144 = vmatmul.bf16.gmra.mxu0 %v3092_v50 }
 0x2a1   : > { %v1620_v60 = vpop.f32.mrf.mxu2  ;;  %v1652_v34 = vpop.f32.mrf.mxu3 }
 0x2a2   : > { %v4495_v44 = vadd.f32 %v1620_v60, %v4393_v43  ;;  %v1670_v48 = vadd.f32 %v1652_v34, %v4400_v16  ;;  %v3086_v43 = vld [vmem:[%s4691_s1 + $0x58] sm:$0xff] }
 0x2a3   : > { %2317 = vperm.xlu2 %3130, %v2283_v51  }
 0x2a4   : > { %v4501_v63 = vadd.f32 %v2222_v21, %v1670_v48 }
 0x2a5   : > { %1977 = vmatmul.bf16.gmra.mxu2 %v3085_v35  ;;  %2173 = vmatmul.bf16.gmra.mxu1 %v3092_v50  ;;  %v1805_v35 = vpop.f32.mrf.mxu0  ;;  %v1836_v50 = vpop.f32.mrf.mxu1 }
 0x2a6   : > { %4822 = vst [vmem:[#allocation18_spill] sm:$0xff] %v4501_v63 }
 0x2a9   : > { %v1623_v40 = vpop.f32.mrf.mxu2  ;;  %v1654_v2 = vpop.f32.mrf.mxu3 }
 0x2aa   : > { %v1669_v16 = vadd.f32 %v1623_v40, %v4416_v3  ;;  %v4511_v47 = vadd.f32 %v1654_v2, %v4426_v29 }
 0x2ab   : > { %2392 = vperm.xlu2 %3130, %v2362_v33  }
 0x2ac   : > { %4823 = vst [vmem:[#allocation19_spill] sm:$0xff] %v4511_v47  ;;  %v4519_v9 = vadd.f32 %v2221_v32, %v1669_v16 }
 0x2ad   : > { %2011 = vmatmul.bf16.gmra.mxu3 %v3086_v43  ;;  %v1807_v54 = vpop.f32.mrf.mxu0  ;;  %v4529_v42 = vpop.f32.mrf.mxu1 }
 0x2ae   : > { %4824 = vst [vmem:[#allocation20_spill] sm:$0xff] %v4519_v9 }
 0x2af   : > { %2149 = vmatmul.bf16.gmra.mxu0 %v3093_v30 }
 0x2b1   : > { %v1625_v3 = vpop.f32.mrf.mxu2 }
 0x2b2   : > { %v4524_v29 = vadd.f32 %v1625_v3, %v1454_v11 }
 0x2b3   : > { %2450 = vperm.xlu2 %3130, %v2447_v61  }
 0x2b4   : > { %4825 = vst [vmem:[#allocation21_spill] sm:$0xff] %v4524_v29  ;;  %v756_v29 = vadd.f32 %v4096_v14, %v4079_v23  ;;  %v785_v23 = vadd.f32 %v4084_v20, %v4075_v52 }
 0x2b5   : > { %1982 = vmatmul.bf16.gmra.mxu2 %v3086_v43  ;;  %2178 = vmatmul.bf16.gmra.mxu1 %v3093_v30  ;;  %v1810_v25 = vpop.f32.mrf.mxu0  ;;  %v4533_v11 = vpop.f32.mrf.mxu1 }
 0x2b6   : > { %v1112_v4 = vadd.f32 %v4160_v17, %v756_v29 }
 0x2bd   : > { %v4531_v60 = vpop.f32.mrf.mxu0  ;;  %v4537_v48 = vpop.f32.mrf.mxu1 }
 0x2bf   : > { %2154 = vmatmul.bf16.gmra.mxu0 %v3094_v26 }
 0x2c5   : > { %2183 = vmatmul.bf16.gmra.mxu1 %v3094_v26  ;;  %v4535_v34 = vpop.f32.mrf.mxu0  ;;  %v4541_v51 = vpop.f32.mrf.mxu1  ;;  %v4829_v26 = vand.u32 15, %v4322_v62 }
 0x2c7   : > { %vm4553_vm12 = vcmp.ne.s32.totalorder %v4829_v26, 15 }
 0x2cd   : > { %v4539_v21 = vpop.f32.mrf.mxu0  ;;  %v4545_v2 = vpop.f32.mrf.mxu1 }
 0x2ce   : > { %4826 = vst [vmem:[#allocation30_spill] sm:$0xff] %v4545_v2 }
 0x2d5   : > { %v4543_v40 = vpop.f32.mrf.mxu0  ;;  %v4549_v33 = vpop.f32.mrf.mxu1 }
 0x2d6   : > { %4828 = vst [vmem:[#allocation31_spill] sm:$0xff] %v4549_v33 }
 0x2d7   : > { %v2293_v30 = vpop.permute.xlu1 %2292 }
 0x2dd   : > { %v4547_v16 = vpop.f32.mrf.mxu0 }
 0x2de   : > { %4827 = vst [vmem:[#allocation14_spill] sm:$0xff] %v4547_v16 }
 0x2e0   : > { %v4562_v9 = vpop.permute.xlu2 %2297 }
 0x2e4   : > { %v4573_v14 = vpop.permute.xlu1 %2302 }
 0x2e5   : > { %v2288_v17 = vpop.permute.xlu0 %2287 }
 0x300   : > { %v1997_v43 = vpop.f32.mrf.mxu3 }
 0x301   : > { %v1998_v33 = vadd.f32 %v1997_v43, %v1834_v24 }
 0x308   : > { %v1968_v32 = vpop.f32.mrf.mxu2  ;;  %v1999_v3 = vpop.f32.mrf.mxu3 }
 0x309   : > { %v1969_v61 = vadd.f32 %v1968_v32, %v1805_v35  ;;  %v4832_v35 = vand.u32 15, %v4334_v56 }
 0x30b   : > { %vm4567_vm13 = vcmp.ne.s32.totalorder %v4832_v35, 15  ;;  %v1113_v35 = vadd.f32 %v4156_v5, %v785_v23 }
 0x30c   : > { %v2140_v63 = vpop.f32.mrf.mxu0 }
 0x30d   : > { %v2189_v0 = vadd.f32 %v2140_v63, %v1969_v61 }
 0x30f   : > { %v2245_v16 = vsel %vm4553_vm12, %v2189_v0, 0.0 }
 0x310   : > { %v1970_v2 = vpop.f32.mrf.mxu2  ;;  %v2261_v62 = vadd.f32 %v2245_v16, %v4390_v45  ;;  %v2002_v29 = vpop.f32.mrf.mxu3  ;;  %v2211_v45 = vsel %vm4375_vm11, %v1112_v4, 0.0 }
 0x311   : > { %v1971_v0 = vadd.f32 %v1970_v2, %v1807_v54  ;;  %v2227_v16 = vadd.f32 %v2211_v45, %v4403_v59 }
 0x312   : > { %v2169_v26 = vpop.f32.mrf.mxu1  ;;  %v2325_v61 = vadd.f32 %v2288_v17, %v2261_v62 }
 0x313   : > { %v2190_v63 = vadd.f32 %v2169_v26, %v1998_v33  ;;  %v2000_v33 = vadd.f32 %v1999_v3, %v1836_v50  ;;  %v2368_v3 = vpop.permute.xlu0 %2367 }
 0x314   : > { %v2142_v24 = vpop.f32.mrf.mxu0  ;;  %v2341_v26 = vmax.f32 %v2325_v61, 0.0 }
 0x315   : > { %v2246_v56 = vsel %vm4567_vm13, %v2190_v63, 0.0  ;;  %v2191_v43 = vadd.f32 %v2142_v24, %v1971_v0  ;;  %v2212_v63 = vsel %vm4350_vm10, %v1113_v35, 0.0  ;;  %v4586_v0 = vpop.permute.xlu2 %2307 }
 0x316   : > { %v2262_v20 = vadd.f32 %v2246_v56, %v4360_v1  ;;  %v2228_v5 = vadd.f32 %v2212_v63, %v4381_v22  ;;  %v761_v1 = vadd.f32 %v4141_v28, %v4117_v37  ;;  %v2373_v56 = vpop.permute.xlu1 %2372  ;;  %v2003_v28 = vadd.f32 %v2002_v29, %v4529_v42 }
 0x317   : > { %v2247_v52 = vsel %vm4553_vm12, %v2191_v43, 0.0 }
 0x318   : > { %v1973_v54 = vpop.f32.mrf.mxu2  ;;  %v2263_v2 = vadd.f32 %v2247_v52, %v2227_v16  ;;  %v2326_v23 = vadd.f32 %v2288_v17, %v2262_v20  ;;  %v2004_v16 = vpop.f32.mrf.mxu3  ;;  %v2405_v52 = vmul.f32 %v2368_v3, %v2341_v26  ;;  %v1116_v37 = vadd.f32 %v4197_v18, %v761_v1 }
 0x319   : > { %v1974_v59 = vadd.f32 %v1973_v54, %v1810_v25  ;;  %v790_v26 = vadd.f32 %v4123_v46, %v4110_v15 }
 0x31a   : > { %v2327_v53 = vadd.f32 %v2293_v30, %v2263_v2  ;;  %v2171_v4 = vpop.f32.mrf.mxu1  ;;  %v2342_v22 = vmax.f32 %v2326_v23, 0.0 }
 0x31b   : > { %v2192_v62 = vadd.f32 %v2171_v4, %v2000_v33  ;;  %v1117_v46 = vadd.f32 %v4195_v10, %v790_v26 }
 0x31c   : > { %v2343_v24 = vmax.f32 %v2327_v53, 0.0  ;;  %v2145_v45 = vpop.f32.mrf.mxu0 }
 0x31d   : > { %v2248_v50 = vsel %vm4567_vm13, %v2192_v62, 0.0  ;;  %v2193_v43 = vadd.f32 %v2145_v45, %v1974_v59  ;;  %v2378_v18 = vpop.permute.xlu2 %2377 }
 0x31e   : > { %v2264_v61 = vadd.f32 %v2248_v50, %v2228_v5  ;;  %v2407_v35 = vmul.f32 %v2373_v56, %v2343_v24 }
 0x31f   : > { %v2249_v25 = vsel %vm4553_vm12, %v2193_v43, 0.0 }
 0x320   : > { %v2328_v17 = vadd.f32 %v2293_v30, %v2264_v61  ;;  %v2421_v53 = vadd.f32 %v2407_v35, %v2405_v52  ;;  %v1975_v20 = vpop.f32.mrf.mxu2  ;;  %v2265_v54 = vadd.f32 %v2249_v25, %v4442_v57  ;;  %v2406_v30 = vmul.f32 %v2368_v3, %v2342_v22  ;;  %v4616_v22 = vpop.permute.xlu0 %2312 }
 0x321   : > { %v1976_v63 = vadd.f32 %v1975_v20, %v4531_v60  ;;  %v2215_v57 = vsel %vm4375_vm11, %v1116_v37, 0.0  ;;  %v2005_v35 = vadd.f32 %v2004_v16, %v4533_v11  ;;  %v766_v11 = vadd.f32 %v4181_v41, %v4041_v7  ;;  %v2383_v16 = vpop.permute.xlu1 %2382 }
 0x322   : > { %v2344_v2 = vmax.f32 %v2328_v17, 0.0  ;;  %v2329_v33 = vadd.f32 %v4562_v9, %v2265_v54  ;;  %v2174_v4 = vpop.f32.mrf.mxu1  ;;  %v2231_v24 = vadd.f32 %v2215_v57, %v4453_v31  ;;  %v795_v57 = vadd.f32 %v4166_v8, %v4028_v36 }
 0x323   : > { %v2194_v59 = vadd.f32 %v2174_v4, %v2003_v28 }
 0x324   : > { %v2408_v62 = vmul.f32 %v2373_v56, %v2344_v2  ;;  %v2345_v5 = vmax.f32 %v2329_v33, 0.0  ;;  %v2147_v23 = vpop.f32.mrf.mxu0  ;;  %v2007_v56 = vpop.f32.mrf.mxu3 }
 0x325   : > { %v2250_v42 = vsel %vm4567_vm13, %v2194_v59, 0.0  ;;  %v2195_v29 = vadd.f32 %v2147_v23, %v1976_v63  ;;  %v2008_v7 = vadd.f32 %v2007_v56, %v4537_v48 }
 0x326   : > { %v2434_v45 = vadd.f32 %v2408_v62, %v2406_v30  ;;  %v2409_v1 = vmul.f32 %v2378_v18, %v2345_v5  ;;  %v2266_v15 = vadd.f32 %v2250_v42, %v4413_v55  ;;  %v2216_v55 = vsel %vm4350_vm10, %v1117_v46, 0.0 }
 0x327   : > { %v2251_v60 = vsel %vm4553_vm12, %v2195_v29, 0.0  ;;  %v1120_v62 = vadd.f32 %v4231_v38, %v766_v11 }
 0x328   : > { %v2422_v50 = vadd.f32 %v2421_v53, %v2409_v1  ;;  %v2330_v3 = vadd.f32 %v4562_v9, %v2266_v15  ;;  %v1978_v43 = vpop.f32.mrf.mxu2  ;;  %v2267_v61 = vadd.f32 %v2251_v60, %v2231_v24  ;;  %v2232_v53 = vadd.f32 %v2216_v55, %v4430_v12  ;;  %v2388_v48 = vpop.permute.xlu0 %2387 }
 0x329   : > { %v1979_v10 = vadd.f32 %v1978_v43, %v4535_v34  ;;  %v2219_v38 = vsel %vm4375_vm11, %v1120_v62, 0.0 }
 0x32a   : > { %v2346_v52 = vmax.f32 %v2330_v3, 0.0  ;;  %v2331_v31 = vadd.f32 %v4573_v14, %v2267_v61  ;;  %v2176_v25 = vpop.f32.mrf.mxu1  ;;  %v2235_v15 = vadd.f32 %v2219_v38, %v4495_v44 }
 0x32b   : > { %v2196_v17 = vadd.f32 %v2176_v25, %v2005_v35 }
 0x32c   : > { %v2410_v20 = vmul.f32 %v2378_v18, %v2346_v52  ;;  %v2347_v9 = vmax.f32 %v2331_v31, 0.0  ;;  %v2150_v54 = vpop.f32.mrf.mxu0  ;;  %v2009_v41 = vpop.f32.mrf.mxu3 }
 0x32d   : > { %v2252_v37 = vsel %vm4567_vm13, %v2196_v17, 0.0  ;;  %v2197_v28 = vadd.f32 %v2150_v54, %v1979_v10  ;;  %v4633_v18 = vpop.permute.xlu2 %2317  ;;  %v2010_v61 = vadd.f32 %v2009_v41, %v4541_v51  ;;  %v4840_v41 = vld [vmem:[#allocation32_spill] sm:$0xff] }
 0x32e   : > { %v2435_v2 = vadd.f32 %v2434_v45, %v2410_v20  ;;  %v2411_v33 = vmul.f32 %v2383_v16, %v2347_v9  ;;  %v2268_v4 = vadd.f32 %v2252_v37, %v2232_v53  ;;  %v4835_v53 = vld [vmem:[#allocation16_spill] sm:$0xff] }
 0x32f   : > { %v2253_v34 = vsel %vm4553_vm12, %v2197_v28, 0.0  ;;  %v771_v20 = vadd.f32 %v4835_v53, %v4065_v6  ;;  %v4838_v6 = vld [vmem:[#allocation30_spill] sm:$0xff] }
 0x330   : > { %v2423_v26 = vadd.f32 %v2422_v50, %v2411_v33  ;;  %v2332_v12 = vadd.f32 %v4573_v14, %v2268_v4  ;;  %v1980_v63 = vpop.f32.mrf.mxu2  ;;  %v2269_v59 = vadd.f32 %v2253_v34, %v4486_v49  ;;  %v4836_v33 = vld [vmem:[#allocation20_spill] sm:$0xff]  ;;  %v4837_v34 = vld [vmem:[#allocation17_spill] sm:$0xff] }
 0x331   : > { %v1981_v42 = vadd.f32 %v1980_v63, %v4539_v21  ;;  %v1121_v21 = vadd.f32 %v4226_v27, %v795_v57 }
 0x332   : > { %v2348_v30 = vmax.f32 %v2332_v12, 0.0  ;;  %v2333_v5 = vadd.f32 %v4586_v0, %v2269_v59  ;;  %v2179_v23 = vpop.f32.mrf.mxu1 }
 0x333   : > { %v2198_v14 = vadd.f32 %v2179_v23, %v2008_v7  ;;  %v2220_v31 = vsel %vm4350_vm10, %v1121_v21, 0.0  ;;  %v4839_v7 = vld [vmem:[#allocation15_spill] sm:$0xff]  ;;  %v4841_v23 = vld [vmem:[#allocation14_spill] sm:$0xff] }
 0x334   : > { %v2412_v29 = vmul.f32 %v2383_v16, %v2348_v30  ;;  %v2349_v24 = vmax.f32 %v2333_v5, 0.0  ;;  %v2152_v49 = vpop.f32.mrf.mxu0  ;;  %v2236_v25 = vadd.f32 %v2220_v31, %v4478_v39  ;;  %v2012_v55 = vpop.f32.mrf.mxu3  ;;  %v800_v30 = vadd.f32 %v4840_v41, %v4839_v7 }
 0x335   : > { %v2254_v45 = vsel %vm4567_vm13, %v2198_v14, 0.0  ;;  %v2199_v1 = vadd.f32 %v2152_v49, %v1981_v42  ;;  %v2393_v51 = vpop.permute.xlu2 %2392  ;;  %v2013_v12 = vadd.f32 %v2012_v55, %v4838_v6  ;;  %v2323_v5 = vpop.permute.xlu1 %2322 }
 0x336   : > { %v2436_v46 = vadd.f32 %v2435_v2, %v2412_v29  ;;  %v2413_v36 = vmul.f32 %v2388_v48, %v2349_v24  ;;  %v2270_v8 = vadd.f32 %v2254_v45, %v4462_v13  ;;  %v2398_v49 = vpop.permute.xlu0 %2397  ;;  %v4842_v45 = vld [vmem:[#allocation21_spill] sm:$0xff] }
 0x337   : > { %v2255_v60 = vsel %vm4553_vm12, %v2199_v1, 0.0 }
 0x338   : > { %v2424_v56 = vadd.f32 %v2423_v26, %v2413_v36  ;;  %v2334_v50 = vadd.f32 %v4586_v0, %v2270_v8  ;;  %v1983_v3 = vpop.f32.mrf.mxu2  ;;  %v2271_v43 = vadd.f32 %v2255_v60, %v2235_v15  ;;  %v1124_v26 = vadd.f32 %v4837_v34, %v771_v20  ;;  %v4843_v8 = vld [vmem:[#allocation18_spill] sm:$0xff]  ;;  %v4844_v60 = vld [vmem:[#allocation27_spill] sm:$0xff] }
 0x339   : > { %v1984_v13 = vadd.f32 %v1983_v3, %v4543_v40 }
 0x33a   : > { %v2350_v35 = vmax.f32 %v2334_v50, 0.0  ;;  %v2335_v52 = vadd.f32 %v4616_v22, %v2271_v43  ;;  %v2181_v44 = vpop.f32.mrf.mxu1  ;;  %v2223_v24 = vsel %vm4375_vm11, %v1124_v26, 0.0 }
 0x33b   : > { %v2200_v27 = vadd.f32 %v2181_v44, %v2010_v61  ;;  %v2239_v1 = vadd.f32 %v2223_v24, %v4842_v45  ;;  %v4845_v61 = vld [vmem:[#allocation31_spill] sm:$0xff] }
 0x33c   : > { %v2414_v10 = vmul.f32 %v2388_v48, %v2350_v35  ;;  %v2351_v17 = vmax.f32 %v2335_v52, 0.0  ;;  %v2155_v0 = vpop.f32.mrf.mxu0  ;;  %v2014_v15 = vpop.f32.mrf.mxu3 }
 0x33d   : > { %v2256_v9 = vsel %vm4567_vm13, %v2200_v27, 0.0  ;;  %v2201_v54 = vadd.f32 %v2155_v0, %v1984_v13  ;;  %v2015_v35 = vadd.f32 %v2014_v15, %v4845_v61  ;;  %v2403_v0 = vpop.permute.xlu1 %2402  ;;  %v2451_v32 = vpop.permute.xlu2 %2450 }
 0x33e   : > { %v2437_v11 = vadd.f32 %v2436_v46, %v2414_v10  ;;  %v2415_v16 = vmul.f32 %v2393_v51, %v2351_v17  ;;  %v2272_v37 = vadd.f32 %v2256_v9, %v2236_v25  ;;  %v4846_v25 = vld [vmem:[#allocation19_spill] sm:$0xff]  ;;  %v2453_v6 = vperm.slane %v2451_v32, 0 }
 0x33f   : > { %v2257_v40 = vsel %vm4553_vm12, %v2201_v54, 0.0 }
 0x340   : > { %v2425_v28 = vadd.f32 %v2424_v56, %v2415_v16  ;;  %v2336_v39 = vadd.f32 %v4616_v22, %v2272_v37  ;;  %v1985_v2 = vpop.f32.mrf.mxu2  ;;  %v2273_v4 = vadd.f32 %v2257_v40, %v4836_v33  ;;  %v1125_v56 = vadd.f32 %v4844_v60, %v800_v30 }
 0x341   : > { %v1986_v57 = vadd.f32 %v1985_v2, %v4841_v23 }
 0x342   : > { %v2352_v63 = vmax.f32 %v2336_v39, 0.0  ;;  %v2337_v59 = vadd.f32 %v4633_v18, %v2273_v4  ;;  %v2184_v62 = vpop.f32.mrf.mxu1  ;;  %v2224_v13 = vsel %vm4350_vm10, %v1125_v56, 0.0 }
 0x343   : > { %v2202_v42 = vadd.f32 %v2184_v62, %v2013_v12  ;;  %v2240_v55 = vadd.f32 %v2224_v13, %v4846_v25  ;;  %v4847_v62 = vlaneseq }
 0x344   : > { %v2416_v14 = vmul.f32 %v2393_v51, %v2352_v63  ;;  %v2353_v22 = vmax.f32 %v2337_v59, 0.0  ;;  %v2157_v29 = vpop.f32.mrf.mxu0 }
 0x345   : > { %v2258_v38 = vsel %vm4567_vm13, %v2202_v42, 0.0  ;;  %v2203_v48 = vadd.f32 %v2157_v29, %v1986_v57  ;;  %vm2464_vm15 = vcmp.lt.s32.totalorder %v4847_v62, 256 }
 0x346   : > { %v2438_v46 = vadd.f32 %v2437_v11, %v2416_v14  ;;  %v2417_v36 = vmul.f32 %v2398_v49, %v2353_v22  ;;  %v2274_v21 = vadd.f32 %v2258_v38, %v4843_v8 }
 0x347   : > { %v2259_v50 = vsel %vm4553_vm12, %v2203_v48, 0.0 }
 0x348   : > { %v2426_v3 = vadd.f32 %v2425_v28, %v2417_v36  ;;  %v2338_v19 = vadd.f32 %v4633_v18, %v2274_v21  ;;  %v2275_v43 = vadd.f32 %v2259_v50, %v2239_v1 }
 0x34a   : > { %v2354_v52 = vmax.f32 %v2338_v19, 0.0  ;;  %v2339_v44 = vadd.f32 %v2323_v5, %v2275_v43  ;;  %v2186_v31 = vpop.f32.mrf.mxu1 }
 0x34b   : > { %v2204_v27 = vadd.f32 %v2186_v31, %v2015_v35 }
 0x34c   : > { %v2418_v10 = vmul.f32 %v2398_v49, %v2354_v52  ;;  %v2355_v17 = vmax.f32 %v2339_v44, 0.0 }
 0x34d   : > { %v2260_v47 = vsel %vm4567_vm13, %v2204_v27, 0.0 }
 0x34e   : > { %v2439_v53 = vadd.f32 %v2438_v46, %v2418_v10  ;;  %v2419_v18 = vmul.f32 %v2403_v0, %v2355_v17  ;;  %v2276_v20 = vadd.f32 %v2260_v47, %v2240_v55 }
 0x350   : > { %v2427_v51 = vadd.f32 %v2426_v3, %v2419_v18  ;;  %v2340_v9 = vadd.f32 %v2323_v5, %v2276_v20 }
 0x352   : > { %v2428_v54 = vrot.slane %v2427_v51, 4  ;;  %v2356_v11 = vmax.f32 %v2340_v9, 0.0 }
 0x354   : > { %v2429_v16 = vadd.f32 %v2428_v54, %v2427_v51  ;;  %v2420_v58 = vmul.f32 %v2403_v0, %v2356_v11 }
 0x356   : > { %v2430_v37 = vrot.slane %v2429_v16, 2  ;;  %v2440_v40 = vadd.f32 %v2439_v53, %v2420_v58 }
 0x358   : > { %v2441_v28 = vrot.slane %v2440_v40, 4  ;;  %v2431_v39 = vadd.f32 %v2430_v37, %v2429_v16 }
 0x35a   : > { %v2442_v2 = vadd.f32 %v2441_v28, %v2440_v40  ;;  %v2432_v4 = vrot.slane %v2431_v39, 1 }
 0x35c   : > { %v2443_v33 = vrot.slane %v2442_v2, 2  ;;  %v2433_v12 = vadd.f32 %v2432_v4, %v2431_v39 }
 0x35e   : > { %v2444_v34 = vadd.f32 %v2443_v33, %v2442_v2  ;;  %v2454_v7 = vadd.f32 %v2453_v6, %v2433_v12 }
 0x360   : > { %v2445_v26 = vrot.slane %v2444_v34, 1 }
 0x362   : > { %v2446_v63 = vadd.f32 %v2445_v26, %v2444_v34 }
 0x364   : > { %v2455_v59 = vadd.f32 %v2453_v6, %v2446_v63 }
 0x366   : > { %v2458_v41 = vrot.slane %v2455_v59, 7 }
 0x368   : > { %v2460_v30 = vsel %vm2459_vm14, %v2454_v7, %v2458_v41 }
 0x369   : > { %2466 = vst.msk [vmem:[%s224_s19] sm:$0x3] %vm2464_vm15, %v2460_v30 }
 0x36a PF: > { %s17_s20 = sadd.s32 1, %s3137_s20  }
 0x36b   : > { %p14_p4 = scmp.ge.s32.totalorder %s17_s20, 4  }
 0x36d   :  { %16 = sbr.rel (!%p14_p4) target bundleno = 3 (0x3), region = 78 }

</bundles_post_ra>
